<compile_context>
chip_gen: v6e
topology: v6e:2x2x1
jax: 0.10.0
libtpu: 0.0.40
codegen_flags: <defaults>
</compile_context>

<pallas_src>
import functools
import math

import jax
import jax.numpy as jnp
from jax.experimental import pallas as pl
from jax.experimental.pallas import tpu as pltpu


_LANE_CHOICES = (1024, 512, 256, 128)
_SMALL_BYTES = 128 * 1024            # below this, pallas_call fixed cost dominates
_VMEM_HEADROOM = 4 * 1024 * 1024     # compiler-internal scratch headroom
_MIN_VMEM_LIMIT = 16 * 1024 * 1024
_MAX_VMEM_LIMIT = 40 * 1024 * 1024   # safely under v7x's 64 MiB physical VMEM
_SPLIT_BYTES = 1 * 1024 * 1024       # split 1-step grids above this (2 TCs on v7x)


# ---------------------------------------------------------------------------
# Generation-aware sizing helpers
# ---------------------------------------------------------------------------

def _device_kind():
    try:
        return jax.devices()[0].device_kind.lower()
    except Exception:
        return ""


@functools.lru_cache(maxsize=None)
def _tile_target_bytes():
    """Per-buffer VMEM tile target.

    v5e : scoped-VMEM default is ~16 MiB -> 1.5 MiB tiles (3 arrays x 2 bufs = 9 MiB).
    v6e : 128 MiB physical -> 4 MiB tiles sit on the HBM-BW plateau.
    v7x : 64 MiB physical, 3.2 TB/s HBM -> 4 MiB tiles amortize per-step overhead.
    """
    kind = _device_kind()
    if ("v5 lite" in kind) or ("v5e" in kind) or ("v5lite" in kind):
        return 1536 * 1024
    if ("v6" in kind) or ("v7" in kind) or ("7x" in kind):
        return 4 * 1024 * 1024
    return 2 * 1024 * 1024


def _vmem_limit(single_buffer_block_bytes):
    """Explicit scoped-VMEM limit: double-buffered blocks + headroom, clamped."""
    need = 2 * single_buffer_block_bytes + _VMEM_HEADROOM
    return int(min(max(need, _MIN_VMEM_LIMIT), _MAX_VMEM_LIMIT))


def _plan_flat(total):
    """Lane-dense 2-D view (rows, lanes); caller guarantees total % 128 == 0."""
    for lanes in _LANE_CHOICES:
        if total % lanes == 0:
            return total // lanes, lanes
    raise AssertionError("caller must guarantee total % 128 == 0")


def _row_block(rows, lanes, itemsize, total_bytes):
    """Row-block size: per-generation tile target, multiple of 16 sublanes."""
    br = _tile_target_bytes() // (lanes * itemsize)
    br = max(16, min(br, 2048))
    br = (br // 16) * 16
    if rows > br:
        return br
    # Whole array fits in one tile: if it is still bandwidth-bound, split into
    # two grid steps so the "parallel" row axis shards across v7x's 2 TCs.
    if total_bytes >= _SPLIT_BYTES and rows >= 16 and rows % 16 == 0:
        return rows // 2
    return rows


# ---------------------------------------------------------------------------
# Kernels
# ---------------------------------------------------------------------------

def _binary_kernel(x_ref, y_ref, o_ref, *, op):
    # Promote on-chip; VPU casts hide under the (mem-bound) DMA.
    o_ref[...] = op(x_ref[...].astype(o_ref.dtype),
                    y_ref[...].astype(o_ref.dtype))


def _scalar_kernel(s_ref, x_ref, o_ref, *, op):
    s = s_ref[0].astype(o_ref.dtype)          # scalar lives in SMEM
    o_ref[...] = op(x_ref[...].astype(o_ref.dtype), s)


def _cat_kernel(*refs, widths):
    o_ref = refs[-1]
    off = 0
    for r, w in zip(refs[:-1], widths):
        # Offsets/widths are 128-aligned (checked by wrapper) -> unmasked vst.
        o_ref[:, off:off + w] = r[...].astype(o_ref.dtype)
        off += w


_OPS = {
    "add": (lambda a, b: a + b, 1),
    "mul": (lambda a, b: a * b, 1),
    "add_relu": (lambda a, b: jnp.maximum(a + b, 0), 2),
}
_COMMUTATIVE = frozenset(("add", "mul", "add_relu"))


# ---------------------------------------------------------------------------
# Wrappers
# ---------------------------------------------------------------------------

def _elementwise_scalar(op_name, x, scalar, out_dtype=None):
    op, flops_per_elem = _OPS[op_name]
    x = jnp.asarray(x)
    if out_dtype is None:
        # torch-style promotion: int tensor + python float -> float tensor.
        out_dtype = jnp.result_type(x.dtype, scalar)
    out_shape = x.shape
    total = int(x.size)
    out_itemsize = jnp.dtype(out_dtype).itemsize
    if total == 0:
        return jnp.zeros(out_shape, out_dtype)

    # Tiny or ragged sizes: pallas_call fixed cost (or a pad + slice HBM
    # round-trip) would dominate a mem-bound op; let fused XLA handle it.
    if (total * max(x.dtype.itemsize, out_itemsize) < _SMALL_BYTES
            or total % 128 != 0):
        s = jnp.asarray(scalar).astype(out_dtype)
        return op(x.astype(out_dtype), s)

    # Carry the scalar through SMEM at 32-bit width; cast on-chip.
    # TODO(synk): narrow-int outputs (int8/uint8) wrap on the on-chip cast.
    if jnp.issubdtype(jnp.dtype(out_dtype), jnp.floating):
        s_dtype = jnp.float32
    else:
        s_dtype = jnp.int32
    s = jnp.asarray(scalar).astype(s_dtype).reshape((1,))

    rows, lanes = _plan_flat(total)
    itemsize = max(x.dtype.itemsize, out_itemsize)
    br = _row_block(rows, lanes, itemsize, total * itemsize)
    x2 = x.reshape(rows, lanes)

    block_bytes = br * lanes * (x.dtype.itemsize + out_itemsize)
    bytes_accessed = total * (x.dtype.itemsize + out_itemsize)
    out2 = pl.pallas_call(
        functools.partial(_scalar_kernel, op=op),
        out_shape=jax.ShapeDtypeStruct((rows, lanes), out_dtype),
        grid=(pl.cdiv(rows, br),),
        in_specs=[
            pl.BlockSpec(memory_space=pltpu.SMEM),
            pl.BlockSpec((br, lanes), lambda i: (i, 0)),
        ],
        out_specs=pl.BlockSpec((br, lanes), lambda i: (i, 0)),
        compiler_params=pltpu.CompilerParams(
            dimension_semantics=("parallel",),
            vmem_limit_bytes=_vmem_limit(block_bytes)),
        cost_estimate=pl.CostEstimate(flops=flops_per_elem * total,
                                      transcendentals=0,
                                      bytes_accessed=int(bytes_accessed)),
    )(s, x2)
    return out2.reshape(out_shape)


def _elementwise_binary(op_name, x, y):
    op, flops_per_elem = _OPS[op_name]
    x = jnp.asarray(x)
    y = jnp.asarray(y)
    out_shape = jnp.broadcast_shapes(x.shape, y.shape)
    out_dtype = jnp.result_type(x.dtype, y.dtype)

    # Route size-1 operands through the SMEM-scalar path (avoids a full-size
    # HBM broadcast). Guarded on commutativity so a future sub/div is safe.
    if op_name in _COMMUTATIVE:
        if y.size == 1 and x.shape == out_shape:
            return _elementwise_scalar(op_name, x, y.reshape(()),
                                       out_dtype=out_dtype)
        if x.size == 1 and y.shape == out_shape:
            return _elementwise_scalar(op_name, y, x.reshape(()),
                                       out_dtype=out_dtype)

    total = math.prod(out_shape) if out_shape else 1
    if total == 0:
        return jnp.zeros(out_shape, out_dtype)

    out_itemsize = jnp.dtype(out_dtype).itemsize
    small = (total * max(x.dtype.itemsize, y.dtype.itemsize, out_itemsize)
             < _SMALL_BYTES)
    ragged = total % 128 != 0
    needs_bcast = (x.shape != out_shape) or (y.shape != out_shape)
    # TODO(synk): fold size-1-axis broadcasts (e.g. (1,C,1,1) bias) into the
    # kernel via a pinned BlockSpec instead of deferring to fused XLA.
    if small or ragged or needs_bcast:
        return op(x.astype(out_dtype), y.astype(out_dtype))

    rows, lanes = _plan_flat(total)
    itemsize = max(x.dtype.itemsize, y.dtype.itemsize, out_itemsize)
    br = _row_block(rows, lanes, itemsize, total * itemsize)
    x2 = x.reshape(rows, lanes)
    y2 = y.reshape(rows, lanes)

    block_bytes = br * lanes * (x.dtype.itemsize + y.dtype.itemsize
                                + out_itemsize)
    bytes_accessed = total * (x.dtype.itemsize + y.dtype.itemsize
                              + out_itemsize)
    out2 = pl.pallas_call(
        functools.partial(_binary_kernel, op=op),
        out_shape=jax.ShapeDtypeStruct((rows, lanes), out_dtype),
        grid=(pl.cdiv(rows, br),),
        in_specs=[
            pl.BlockSpec((br, lanes), lambda i: (i, 0)),
            pl.BlockSpec((br, lanes), lambda i: (i, 0)),
        ],
        out_specs=pl.BlockSpec((br, lanes), lambda i: (i, 0)),
        compiler_params=pltpu.CompilerParams(
            dimension_semantics=("parallel",),
            vmem_limit_bytes=_vmem_limit(block_bytes)),
        cost_estimate=pl.CostEstimate(flops=flops_per_elem * total,
                                      transcendentals=0,
                                      bytes_accessed=int(bytes_accessed)),
    )(x2, y2)
    return out2.reshape(out_shape)


def _cat(tensors, dim):
    tensors = [jnp.asarray(t) for t in tensors]
    assert len(tensors) >= 1
    if len(tensors) == 1:
        return tensors[0]

    ndim = tensors[0].ndim
    d = dim + ndim if dim < 0 else dim
    base = tensors[0].shape
    for t in tensors[1:]:
        if t.ndim != ndim:
            raise ValueError("cat: rank mismatch")
        for ax in range(ndim):
            if ax != d and t.shape[ax] != base[ax]:
                raise ValueError("cat: non-concat dims must match")

    out_dtype = jnp.result_type(*[t.dtype for t in tensors])
    out_itemsize = jnp.dtype(out_dtype).itemsize
    outer = math.prod(base[:d])
    inner = math.prod(base[d + 1:])
    widths = [t.shape[d] * inner for t in tensors]
    n_total = sum(widths)
    out_shape = list(base)
    out_shape[d] = sum(t.shape[d] for t in tensors)
    out_shape = tuple(out_shape)
    out_bytes = outer * n_total * out_itemsize

    def _fallback():
        return jnp.concatenate([t.astype(out_dtype) for t in tensors], axis=d)

    # Degenerate / tiny outputs: plain XLA copy.
    if outer == 0 or any(w == 0 for w in widths) or out_bytes < _SMALL_BYTES:
        return _fallback()

    # Non-lane-aligned column slices would lower to masked vst.msk + XLU lane
    # shifts (biggest measured store penalty); defer those shapes to XLA.
    # TODO(synk): pure-DMA (HBM->HBM) cat variant to skip VMEM staging.
    off = 0
    for w in widths:
        if off % 128 != 0 or w % 128 != 0:
            return _fallback()
        off += w

    views = [t.reshape(outer, w) for t, w in zip(tensors, widths)]

    itemsize = max(out_itemsize, max(t.dtype.itemsize for t in tensors))
    # Full footprint per block row: inputs (n_total) + output (n_total), each
    # double-buffered -> 4 * n_total * itemsize.
    per_row_bytes = 4 * n_total * itemsize
    budget = 4 * _tile_target_bytes()          # total footprint budget
    br = budget // max(per_row_bytes, 1)
    if br >= outer:
        br = outer
    else:
        br = (br // 8) * 8
        if br < 8:
            # Pathologically wide rows; let XLA do the HBM->HBM copy.
            return _fallback()

    in_block_bytes = br * sum(w * t.dtype.itemsize
                              for w, t in zip(widths, tensors))
    out_block_bytes = br * n_total * out_itemsize
    bytes_accessed = sum(int(t.size) * t.dtype.itemsize for t in tensors) \
        + math.prod(out_shape) * out_itemsize

    out2 = pl.pallas_call(
        functools.partial(_cat_kernel, widths=tuple(widths)),
        out_shape=jax.ShapeDtypeStruct((outer, n_total), out_dtype),
        grid=(pl.cdiv(outer, br),),
        in_specs=[pl.BlockSpec((br, w), lambda i: (i, 0)) for w in widths],
        out_specs=pl.BlockSpec((br, n_total), lambda i: (i, 0)),
        compiler_params=pltpu.CompilerParams(
            dimension_semantics=("parallel",),
            vmem_limit_bytes=_vmem_limit(in_block_bytes + out_block_bytes)),
        cost_estimate=pl.CostEstimate(flops=0, transcendentals=0,
                                      bytes_accessed=int(bytes_accessed)),
    )(*views)
    return out2.reshape(out_shape)


class PallasFunctional:
    """Pallas analogue of pytorch_nndct Functional.

    Provides the underlying ops (add, cat, mul, add_relu, add_scalar,
    mul_scalar). The reference class is abstract: `forward` only raises.
    """

    def add(self, x, y):
        return _elementwise_binary("add", x, y)

    def mul(self, x, y):
        return _elementwise_binary("mul", x, y)

    def add_relu(self, x, y):
        return _elementwise_binary("add_relu", x, y)

    def add_scalar(self, x, scalar):
        return _elementwise_scalar("add", x, scalar)

    def mul_scalar(self, x, scalar):
        return _elementwise_scalar("mul", x, scalar)

    def cat(self, tensors, dim=0):
        return _cat(tensors, dim)

    def forward(self, x):
        # Abstract in the reference module.
        raise RuntimeError(
            'Functional is an abstract class, please use its derived classes.')


if __name__ == "__main__":
    key = jax.random.PRNGKey(0)
    k1, k2, k3, k4, k5, k6 = jax.random.split(key, 6)

    f = PallasFunctional()

    # --- Small NCHW shapes (correctness; routed through fused-XLA fallback) ---
    x = jax.random.normal(k1, (2, 4, 16, 16), dtype=jnp.float32)
    y = jax.random.normal(k2, (2, 4, 16, 16), dtype=jnp.float32)

    assert jnp.allclose(jax.block_until_ready(f.add(x, y)), x + y, atol=1e-6)
    assert jnp.allclose(jax.block_until_ready(f.mul(x, y)), x * y, atol=1e-6)
    assert jnp.allclose(jax.block_until_ready(f.add_relu(x, y)),
                        jnp.maximum(x + y, 0.0), atol=1e-6)
    assert jnp.allclose(jax.block_until_ready(f.add_scalar(x, 2.5)),
                        x + 2.5, atol=1e-6)
    assert jnp.allclose(jax.block_until_ready(f.mul_scalar(x, -1.5)),
                        x * -1.5, atol=1e-6)
    small_cat = jax.block_until_ready(f.cat([x, y], dim=1))
    assert small_cat.shape == (2, 8, 16, 16)
    assert jnp.allclose(small_cat, jnp.concatenate([x, y], axis=1), atol=1e-6)

    # 0-d tensors (docstring example: add of two scalar tensors).
    a = jnp.asarray(3.0)
    b = jnp.asarray(4.0)
    out_ab = jax.block_until_ready(f.add(a, b))
    assert out_ab.shape == () and jnp.allclose(out_ab, 7.0)

    # --- Larger shapes that exercise the Pallas elementwise kernels ---
    xb = jax.random.normal(k3, (8, 64, 32, 32), dtype=jnp.float32)  # 2 MiB
    yb = jax.random.normal(k4, (8, 64, 32, 32), dtype=jnp.float32)

    assert jnp.allclose(jax.block_until_ready(f.add(xb, yb)), xb + yb, atol=1e-6)
    assert jnp.allclose(jax.block_until_ready(f.mul(xb, yb)), xb * yb, atol=1e-6)
    assert jnp.allclose(jax.block_until_ready(f.add_relu(xb, yb)),
                        jnp.maximum(xb + yb, 0.0), atol=1e-6)
    assert jnp.allclose(jax.block_until_ready(f.add_scalar(xb, 2.5)),
                        xb + 2.5, atol=1e-6)
    assert jnp.allclose(jax.block_until_ready(f.mul_scalar(xb, -1.5)),
                        xb * -1.5, atol=1e-6)

    # Mixed dtypes promoted on-chip (bf16 + f32 -> f32).
    xbb = xb.astype(jnp.bfloat16)
    out_mixed = jax.block_until_ready(f.add(xbb, yb))
    assert out_mixed.dtype == jnp.float32
    assert jnp.allclose(out_mixed, xbb.astype(jnp.float32) + yb, atol=1e-2)

    # Torch-style promotion: int tensor + float scalar -> float tensor.
    xi = jnp.arange(8 * 64 * 32 * 32, dtype=jnp.int32).reshape(8, 64, 32, 32)
    out_is = jax.block_until_ready(f.add_scalar(xi, 2.5))
    assert out_is.dtype == jnp.float32
    assert jnp.allclose(out_is, xi.astype(jnp.float32) + 2.5, atol=1e-3)

    # --- Lane-aligned channel concat that exercises the Pallas cat kernel ---
    xc = jax.random.normal(k5, (32, 16, 16, 16), dtype=jnp.float32)
    yc = jax.random.normal(k6, (32, 16, 16, 16), dtype=jnp.float32)
    out_cat2 = jax.block_until_ready(f.cat([xc, yc], dim=1))
    assert out_cat2.shape == (32, 32, 16, 16)
    assert jnp.allclose(out_cat2, jnp.concatenate([xc, yc], axis=1), atol=1e-6)
    out_cat3 = jax.block_until_ready(f.cat([xc, yc, xc], dim=1))
    assert out_cat3.shape == (32, 48, 16, 16)
    assert jnp.allclose(out_cat3, jnp.concatenate([xc, yc, xc], axis=1),
                        atol=1e-6)

    # Non-lane-aligned concat (last dim) takes the guarded XLA fallback.
    out_cat_last = jax.block_until_ready(f.cat([xc, yc], dim=3))
    assert jnp.allclose(out_cat_last, jnp.concatenate([xc, yc], axis=3),
                        atol=1e-6)

    print("KERNEL_OK")
</pallas_src>

<mosaic_0001>
module attributes {stable_mosaic.version = 11 : i64} {
  func.func @_binary_kernel(%arg0: i32, %arg1: memref<256x1024xf32, #tpu.memory_space<vmem>>, %arg2: memref<256x1024xf32, #tpu.memory_space<vmem>>, %arg3: memref<256x1024xf32, #tpu.memory_space<vmem>>) attributes {dimension_semantics = [#tpu.dimension_semantics<parallel>], iteration_bounds = array<i64: 2>, scalar_prefetch = 0 : i64, scratch_operands = 0 : i64, tpu.core_type = #tpu.core_type<tc>, window_params = [{transform_indices = @transform_0, window_bounds = array<i64: 256, 1024>}, {transform_indices = @transform_1, window_bounds = array<i64: 256, 1024>}, {transform_indices = @transform_2, window_bounds = array<i64: 256, 1024>}]} {
    %c0 = arith.constant 0 : index
    %c0_0 = arith.constant 0 : index
    %0 = vector.load %arg1[%c0, %c0_0] : memref<256x1024xf32, #tpu.memory_space<vmem>>, vector<256x1024xf32>
    %c0_1 = arith.constant 0 : index
    %c0_2 = arith.constant 0 : index
    %1 = vector.load %arg2[%c0_1, %c0_2] : memref<256x1024xf32, #tpu.memory_space<vmem>>, vector<256x1024xf32>
    %2 = arith.addf %0, %1 : vector<256x1024xf32>
    %c0_3 = arith.constant 0 : index
    %c0_4 = arith.constant 0 : index
    %3 = vector.load %arg3[%c0_3, %c0_4] : memref<256x1024xf32, #tpu.memory_space<vmem>>, vector<256x1024xf32>
    tpu.vector_store %arg3[%c0_3, %c0_4], %2 {strides = array<i32>} : memref<256x1024xf32, #tpu.memory_space<vmem>>, vector<256x1024xf32>,
    return
  }
  func.func @transform_0(%arg0: i32) -> (i32, i32) {
    %c0_i32 = arith.constant 0 : i32
    %c0_i32_0 = arith.constant 0 : i32
    return %arg0, %c0_i32 : i32, i32
  }
  func.func @transform_1(%arg0: i32) -> (i32, i32) {
    %c0_i32 = arith.constant 0 : i32
    %c0_i32_0 = arith.constant 0 : i32
    return %arg0, %c0_i32 : i32, i32
  }
  func.func @transform_2(%arg0: i32) -> (i32, i32) {
    %c0_i32 = arith.constant 0 : i32
    %c0_i32_0 = arith.constant 0 : i32
    return %arg0, %c0_i32 : i32, i32
  }
}

</mosaic_0001>

<bundles_post_ra>
// kernel: tpu_custom_call.1
= control target key start
LH: loop header
LB: loop body
LE: loop exit
PB: predicated region body
PF: predicated region fallthrough
CT: control target
= control target key end

     0   :  { %7 = vsyncpa [#allocation3], 0  ;;  %s2565_s0 = inlined_call_operand.hbm [shape: f32[512,1024], index: 0, kind: input, shape index: {}]   ;;  %s2566_s1 = inlined_call_operand.hbm [shape: f32[512,1024], index: 1, kind: input, shape index: {}]   ;;  %s2567_s2 = inlined_call_operand.hbm [shape: f32[512,1024], index: 2, kind: output, shape index: {}]  }
   0x1   :  { %9 = vsyncpa [#allocation3 + $0x1], 0 }
   0x2   :  { %10 = vsyncpa [#allocation6], 0 }
   0x3   :  { %12 = vsyncpa [#allocation6 + $0x1], 0 }
   0x4   :  { %13 = vsyncpa [#allocation4], 0 }
   0x5   :  { %15 = vsyncpa [#allocation4 + $0x1], 0  ;;  %s1572_s9 = smov 0   ;;  %s1574_s10 = smov 0  }
   0x6   :  { %s1576_s11 = smov 0   ;;  %s1578_s12 = smov 0  }
   0x7 LB: > { %s1593_s13 = sadd.s32 4294967295, %s1548_s12   ;;  %s1342_s14 = sadd.s32 4294967294, %s1548_s12   ;;  %s1548_s12 = sphi %s1578_s12, %s2583_s12   ;;  %s1544_s11 = sphi %s1576_s11, %s2582_s11   ;;  %s1540_s10 = sphi %s1574_s10, %s2581_s10   ;;  %s1536_s9 = sphi %s1572_s9, %s2580_s9  }
   0x8   : > { %s1597_s15 = sadd.s32 1, %s1548_s12   ;;  %s28_s16 = sadd.s32 1, %s1544_s11 }
   0x9   : > { %s25_s17 = ssub.s32 %s1548_s12, %s1597_s15  ;;  %p35_p0 = scmp.ne.s32.totalorder %s1544_s11, %s1540_s10 }
   0xa   : > { %p26_p1 = scmp.eq.s32.totalorder %s25_s17, 0  ;;  %p36_p2 = scmp.eq.s32.totalorder %s1548_s12, 0 }
   0xb   : > { %p41_p3 = scmp.ne.s32.totalorder %s1540_s10, %s1536_s9  ;;  %p42_p4 = scmp.eq.s32.totalorder %s1593_s13, 0 }
   0xc   : > { %s1609_s18 = scalar_select %p26_p1, %s1544_s11, %s28_s16  }
   0xd   : > { %p1611_p5 = por %p36_p2, %p35_p0  ;;  %p1615_p6 = por %p42_p4, %p41_p3 }
   0xe   : > { %p91_p7 = scmp.eq.s32.totalorder %s1593_s13, 1  ;;  %p97_p8 = scmp.eq.s32.totalorder %s1342_s14, 1 }
   0xf   : > { %s2571_s20 = scalar_select %p1615_p6, 1, 0 }
  0x10   : > { %p1386_p10 = scmp.lt.s32.totalorder %s1548_s12, 2  ;;  %p1622_p11 = por %p91_p7, %p35_p0 }
  0x11   : > { %p1626_p12 = por %p97_p8, %p41_p3  ;;  %s1631_s23 = sand.u32 1, %s1544_s11  }
  0x12   : > { %s2572_s21 = scalar_select %p1622_p11, 1, 0 }
  0x13   : > { %s2573_s22 = scalar_select %p1626_p12, 1, 0 }
  0x14   : > { %s1364_s24 = sshll.u32 %s1548_s12, 15  ;;  %s1345_s25 = sshll.u32 %s1631_s23, 11 }
  0x15   : > { %s1640_s28 = scalar_lea.hbm %s2565_s0, %s1364_s24  ;;  %s121_s29 = scalar_lea.vmem [#allocation2], %s1345_s25 }
  0x16   : > { %s129_s30 = sshll.u32 %s121_s29, 4  ;;  %p1646_p13 = pnand %p1386_p10, %p1611_p5  ;;  %s1650_s30 = int_to_ptr.vmem [resolvable:$true] %s129_s30 }
  0x17   : > { %s118_s4 = scalar_lea.sflag [#allocation3], %s1631_s23  ;;  %s1424_s5 = scalar_lea.hbm %s1640_s28, 32768 }
  0x18   : > { %p1425_p0 = scmp.ne.s32.totalorder %s1640_s28, %s1424_s5  ;;  %p1426_p1 = pneg %p1646_p13 }
  0x19   : > { %s1429_s8 = scalar_lea.hbm %s2565_s0, 65536  ;;  %p1430_p4 = scmp.lt.s32.totalorder %s1640_s28, %s2565_s0 }
  0x1a   : > { %p1427_p2 = pnand %p1426_p1, %p1425_p0  ;;  %p1431_p5 = scmp.lt.s32.totalorder %s1429_s8, %s1424_s5 }
  0x1c   : > { %p1428_p3 = pneg %p1427_p2  ;;  %p1432_p7 = por %p1431_p5, %p1430_p4 }
  0x1e   : > { %p1433_p8 = pnand %p1432_p7, %p1428_p3 }
  0x20   : > { %1436 = shalt.err (!%p1433_p8)
}
  0x21   : > { %s1437_s17 = scalar_lea.vmem %s1650_s30, 32768  ;;  %s1550_s19 = smov [#allocation2]  }
  0x22   : > { %p1438_p10 = scmp.ne.s32.totalorder %s1650_s30, %s1437_s17  ;;  %s1442_s26 = sshll.u32 %s1550_s19, 4  ;;  %s1443_s26 = int_to_ptr.vmem [resolvable:$false] %s1442_s26 }
  0x23   : > { %s1444_s27 = scalar_lea.vmem %s1443_s26, 65536  ;;  %p1445_p9 = scmp.lt.s32.totalorder %s1650_s30, %s1443_s26 }
  0x24   : > { %p1440_p0 = pnand %p1438_p10, %p1426_p1  ;;  %p1446_p12 = scmp.lt.s32.totalorder %s1444_s27, %s1437_s17 }
  0x26   : > { %p1441_p2 = pneg %p1440_p0  ;;  %p1447_p11 = por %p1446_p12, %p1445_p9 }
  0x28   : > { %p1448_p4 = pnand %p1447_p11, %p1441_p2 }
  0x2a   : > { %1451 = shalt.err (!%p1448_p4)
}
  0x2b   : > { %s1551_s29 = smov 1024   ;;  %s1552_s5 = smov 64  }
  0x2c   : > { %1378 = dma.hbm_to_vmem [thread:$0]  (!%p1646_p13), %s1640_s28, 32768, %s1650_s30, %s118_s4, %s1551_s29, %s1551_s29, %s1552_s5  }
  0x2d   : > { %p1353_p9 = scmp.ge.s32.totalorder %s1548_s12, 1  ;;  %p159_p11 = scmp.lt.s32.totalorder %s1548_s12, 3 }
  0x2e   : > { %s1693_s14 = scalar_lea.hbm %s2566_s1, %s1364_s24  ;;  %s143_s16 = scalar_lea.vmem [#allocation5], %s1345_s25 }
  0x2f   : > { %p1684_p12 = pnand %p1353_p9, %p159_p11  ;;  %s151_s17 = sshll.u32 %s143_s16, 4  ;;  %s1697_s17 = int_to_ptr.vmem [resolvable:$true] %s151_s17 }
  0x30   : > { %s140_s28 = scalar_lea.sflag [#allocation6], %s1631_s23  ;;  %s1452_s30 = scalar_lea.hbm %s1693_s14, 32768 }
  0x31   : > { %p1453_p3 = scmp.ne.s32.totalorder %s1693_s14, %s1452_s30  ;;  %s1457_s24 = scalar_lea.hbm %s2566_s1, 65536 }
  0x32   : > { %p1458_p8 = scmp.lt.s32.totalorder %s1693_s14, %s2566_s1  ;;  %p1459_p10 = scmp.lt.s32.totalorder %s1457_s24, %s1452_s30 }
  0x33   : > { %p1455_p5 = pnand %p1453_p3, %p1426_p1 }
  0x34   : > { %p1460_p0 = por %p1459_p10, %p1458_p8 }
  0x35   : > { %p1456_p7 = pneg %p1455_p5 }
  0x37   : > { %p1461_p2 = pnand %p1460_p0, %p1456_p7 }
  0x39   : > { %1464 = shalt.err (!%p1461_p2)
}
  0x3a   : > { %s1465_s23 = scalar_lea.vmem %s1697_s17, 32768  ;;  %s1553_s25 = smov [#allocation5]  }
  0x3b   : > { %p1466_p4 = scmp.ne.s32.totalorder %s1697_s17, %s1465_s23  ;;  %s1470_s7 = sshll.u32 %s1553_s25, 4  ;;  %s1471_s7 = int_to_ptr.vmem [resolvable:$false] %s1470_s7 }
  0x3c   : > { %s1472_s8 = scalar_lea.vmem %s1471_s7, 65536  ;;  %p1473_p3 = scmp.lt.s32.totalorder %s1697_s17, %s1471_s7 }
  0x3d   : > { %p1468_p9 = pnand %p1466_p4, %p1426_p1  ;;  %p1474_p5 = scmp.lt.s32.totalorder %s1472_s8, %s1465_s23 }
  0x3f   : > { %p1469_p11 = pneg %p1468_p9  ;;  %p1475_p6 = por %p1474_p5, %p1473_p3 }
  0x41   : > { %p1476_p8 = pnand %p1475_p6, %p1469_p11 }
  0x43   : > { %1479 = shalt.err (!%p1476_p8)
}
  0x44   : > { %1381 = dma.hbm_to_vmem [thread:$0]  (!%p1646_p13), %s1693_s14, 32768, %s1697_s17, %s140_s28, %s1551_s29, %s1551_s29, %s1552_s5  }
  0x45   : > { %163 = sbr.rel (%p1684_p12) target bundleno = 293 (0x125), region = 28  ;;  %s1728_s16 = sand.u32 (!%p1684_p12), 1, %s1540_s10  }
  0x46   : > { %s1354_s30 = sshll.u32 (!%p1684_p12), %s1728_s16, 11  ;;  %s166_s4 = scalar_lea.sflag (!%p1684_p12), [#allocation3], %s1728_s16 }
  0x47   : > { %s1732_s19 = scalar_lea.vmem (!%p1684_p12), [#allocation2], %s1354_s30  ;;  %p2576_p6 = scmp.ne.s32.totalorder (!%p1684_p12), %s2571_s20, 0 }
  0x4a   : > { %1523 = dma.done.wait (%p2576_p6), %s166_s4, 32768  }
  0x4b   : > { %1525 = vsyncadd (%p2576_p6), %s166_s4, 4294934528  ;;  %s175_s3 = scalar_lea.sflag [#allocation6], %s1728_s16  ;;  %s1739_s29 = scalar_lea.vmem [#allocation5], %s1354_s30 }
  0x4c   : > { %1527 = dma.done.wait (%p2576_p6), %s175_s3, 32768  }
  0x4d   : > { %1529 = vsyncadd (%p2576_p6), %s175_s3, 4294934528  ;;  %v207_v0 = vld [vmem:[%s1732_s19] sm:$0xff]  ;;  %v208_v2 = vld [vmem:[%s1732_s19 + $0x8] sm:$0xff]  ;;  %s1754_s20 = scalar_lea.vmem [#allocation7], %s1354_s30  ;;  %s1368_s5 = sshll.u32 %s1593_s13, 15 }
  0x4e   : > { %v463_v1 = vld [vmem:[%s1739_s29] sm:$0xff]  ;;  %v464_v4 = vld [vmem:[%s1739_s29 + $0x8] sm:$0xff]  ;;  %v209_v5 = vld [vmem:[%s1732_s19 + $0x10] sm:$0xff]  ;;  %s1246_s6 = sshll.u32 %s1754_s20, 4  ;;  %s2516_s17 = scalar_lea.hbm %s2567_s2, %s1368_s5  ;;  %s2518_s6 = int_to_ptr.vmem [resolvable:$true] %s1246_s6 }
  0x4f   : > { %v719_v3 = vadd.f32 %v463_v1, %v207_v0  ;;  %v465_v6 = vld [vmem:[%s1739_s29 + $0x10] sm:$0xff]  ;;  %v720_v7 = vadd.f32 %v464_v4, %v208_v2  ;;  %v210_v9 = vld [vmem:[%s1732_s19 + $0x18] sm:$0xff]  ;;  %v211_v11 = vld [vmem:[%s1732_s19 + $0x20] sm:$0xff]  ;;  %s1232_s28 = scalar_lea.sflag [#allocation4], %s1728_s16  ;;  %s1480_s24 = scalar_lea.vmem %s2518_s6, 32768 }
  0x50   : > { %v721_v8 = vadd.f32 %v465_v6, %v209_v5  ;;  %v466_v10 = vld [vmem:[%s1739_s29 + $0x18] sm:$0xff]  ;;  %v467_v13 = vld [vmem:[%s1739_s29 + $0x20] sm:$0xff]  ;;  %v212_v14 = vld [vmem:[%s1732_s19 + $0x28] sm:$0xff]  ;;  %p1481_p13 = scmp.ne.s32.totalorder %s2518_s6, %s1480_s24  ;;  %p2577_p1 = scmp.ne.s32.totalorder %s2572_s21, 0 }
  0x51   : > { %975 = vst [vmem:[%s1754_s20] sm:$0xff] %v719_v3  ;;  %v722_v12 = vadd.f32 %v466_v10, %v210_v9  ;;  %v468_v15 = vld [vmem:[%s1739_s29 + $0x28] sm:$0xff]  ;;  %976 = vst [vmem:[%s1754_s20 + $0x8] sm:$0xff] %v720_v7  ;;  %v723_v16 = vadd.f32 %v467_v13, %v211_v11  ;;  %v213_v18 = vld [vmem:[%s1732_s19 + $0x30] sm:$0xff]  ;;  %s1554_s26 = smov [#allocation7]  }
  0x52   : > { %977 = vst [vmem:[%s1754_s20 + $0x10] sm:$0xff] %v721_v8  ;;  %v724_v17 = vadd.f32 %v468_v15, %v212_v14  ;;  %v469_v19 = vld [vmem:[%s1739_s29 + $0x30] sm:$0xff]  ;;  %v214_v20 = vld [vmem:[%s1732_s19 + $0x38] sm:$0xff]  ;;  %v215_v23 = vld [vmem:[%s1732_s19 + $0x40] sm:$0xff]  ;;  %p1482_p12 = pnand %p1481_p13, %p2577_p1  ;;  %s1484_s27 = sshll.u32 %s1554_s26, 4  ;;  %s1485_s27 = int_to_ptr.vmem [resolvable:$false] %s1484_s27 }
  0x53   : > { %978 = vst [vmem:[%s1754_s20 + $0x18] sm:$0xff] %v722_v12  ;;  %v725_v21 = vadd.f32 %v469_v19, %v213_v18  ;;  %v470_v22 = vld [vmem:[%s1739_s29 + $0x38] sm:$0xff]  ;;  %v471_v24 = vld [vmem:[%s1739_s29 + $0x40] sm:$0xff]  ;;  %979 = vst [vmem:[%s1754_s20 + $0x20] sm:$0xff] %v723_v16  ;;  %s1486_s23 = scalar_lea.vmem %s1485_s27, 65536  ;;  %p1487_p10 = scmp.lt.s32.totalorder %s2518_s6, %s1485_s27 }
  0x54   : > { %980 = vst [vmem:[%s1754_s20 + $0x28] sm:$0xff] %v724_v17  ;;  %v726_v25 = vadd.f32 %v470_v22, %v214_v20  ;;  %v727_v26 = vadd.f32 %v471_v24, %v215_v23  ;;  %v216_v27 = vld [vmem:[%s1732_s19 + $0x48] sm:$0xff]  ;;  %v217_v29 = vld [vmem:[%s1732_s19 + $0x50] sm:$0xff]  ;;  %v218_v32 = vld [vmem:[%s1732_s19 + $0x58] sm:$0xff]  ;;  %p1483_p7 = pneg %p1482_p12  ;;  %p1488_p0 = scmp.lt.s32.totalorder %s1486_s23, %s1480_s24 }
  0x55   : > { %v472_v28 = vld [vmem:[%s1739_s29 + $0x48] sm:$0xff]  ;;  %981 = vst [vmem:[%s1754_s20 + $0x30] sm:$0xff] %v725_v21  ;;  %v473_v31 = vld [vmem:[%s1739_s29 + $0x50] sm:$0xff]  ;;  %v474_v33 = vld [vmem:[%s1739_s29 + $0x58] sm:$0xff] }
  0x56   : > { %v728_v30 = vadd.f32 %v472_v28, %v216_v27  ;;  %982 = vst [vmem:[%s1754_s20 + $0x38] sm:$0xff] %v726_v25  ;;  %983 = vst [vmem:[%s1754_s20 + $0x40] sm:$0xff] %v727_v26  ;;  %v729_v34 = vadd.f32 %v473_v31, %v217_v29  ;;  %v730_v35 = vadd.f32 %v474_v33, %v218_v32  ;;  %v219_v36 = vld [vmem:[%s1732_s19 + $0x60] sm:$0xff]  ;;  %v220_v38 = vld [vmem:[%s1732_s19 + $0x68] sm:$0xff]  ;;  %p1489_p2 = por %p1488_p0, %p1487_p10 }
  0x57   : > { %v475_v37 = vld [vmem:[%s1739_s29 + $0x60] sm:$0xff]  ;;  %v476_v40 = vld [vmem:[%s1739_s29 + $0x68] sm:$0xff]  ;;  %v221_v41 = vld [vmem:[%s1732_s19 + $0x70] sm:$0xff] }
  0x58   : > { %984 = vst [vmem:[%s1754_s20 + $0x48] sm:$0xff] %v728_v30  ;;  %v731_v39 = vadd.f32 %v475_v37, %v219_v36  ;;  %v477_v42 = vld [vmem:[%s1739_s29 + $0x70] sm:$0xff]  ;;  %985 = vst [vmem:[%s1754_s20 + $0x50] sm:$0xff] %v729_v34  ;;  %v732_v43 = vadd.f32 %v476_v40, %v220_v38  ;;  %v222_v45 = vld [vmem:[%s1732_s19 + $0x78] sm:$0xff]  ;;  %p1490_p4 = pnand %p1489_p2, %p1483_p7 }
  0x59   : > { %986 = vst [vmem:[%s1754_s20 + $0x58] sm:$0xff] %v730_v35  ;;  %v733_v44 = vadd.f32 %v477_v42, %v221_v41  ;;  %v478_v46 = vld [vmem:[%s1739_s29 + $0x78] sm:$0xff]  ;;  %v223_v47 = vld [vmem:[%s1732_s19 + $0x80] sm:$0xff]  ;;  %v224_v50 = vld [vmem:[%s1732_s19 + $0x88] sm:$0xff] }
  0x5a   : > { %987 = vst [vmem:[%s1754_s20 + $0x60] sm:$0xff] %v731_v39  ;;  %v734_v48 = vadd.f32 %v478_v46, %v222_v45  ;;  %v479_v49 = vld [vmem:[%s1739_s29 + $0x80] sm:$0xff]  ;;  %v480_v51 = vld [vmem:[%s1739_s29 + $0x88] sm:$0xff]  ;;  %988 = vst [vmem:[%s1754_s20 + $0x68] sm:$0xff] %v732_v43 }
  0x5b   : > { %989 = vst [vmem:[%s1754_s20 + $0x70] sm:$0xff] %v733_v44  ;;  %v735_v52 = vadd.f32 %v479_v49, %v223_v47  ;;  %v736_v53 = vadd.f32 %v480_v51, %v224_v50  ;;  %v225_v54 = vld [vmem:[%s1732_s19 + $0x90] sm:$0xff]  ;;  %v226_v56 = vld [vmem:[%s1732_s19 + $0x98] sm:$0xff]  ;;  %v227_v59 = vld [vmem:[%s1732_s19 + $0xa0] sm:$0xff] }
  0x5c   : > { %v481_v55 = vld [vmem:[%s1739_s29 + $0x90] sm:$0xff]  ;;  %990 = vst [vmem:[%s1754_s20 + $0x78] sm:$0xff] %v734_v48  ;;  %v482_v58 = vld [vmem:[%s1739_s29 + $0x98] sm:$0xff]  ;;  %v483_v60 = vld [vmem:[%s1739_s29 + $0xa0] sm:$0xff] }
  0x5d   : > { %v737_v57 = vadd.f32 %v481_v55, %v225_v54  ;;  %991 = vst [vmem:[%s1754_s20 + $0x80] sm:$0xff] %v735_v52  ;;  %992 = vst [vmem:[%s1754_s20 + $0x88] sm:$0xff] %v736_v53  ;;  %v738_v61 = vadd.f32 %v482_v58, %v226_v56  ;;  %v739_v62 = vadd.f32 %v483_v60, %v227_v59  ;;  %v228_v63 = vld [vmem:[%s1732_s19 + $0xa8] sm:$0xff]  ;;  %v229_v1 = vld [vmem:[%s1732_s19 + $0xb0] sm:$0xff] }
  0x5e   : > { %v484_v0 = vld [vmem:[%s1739_s29 + $0xa8] sm:$0xff]  ;;  %v485_v3 = vld [vmem:[%s1739_s29 + $0xb0] sm:$0xff]  ;;  %v230_v4 = vld [vmem:[%s1732_s19 + $0xb8] sm:$0xff] }
  0x5f   : > { %993 = vst [vmem:[%s1754_s20 + $0x90] sm:$0xff] %v737_v57  ;;  %v740_v2 = vadd.f32 %v484_v0, %v228_v63  ;;  %v486_v5 = vld [vmem:[%s1739_s29 + $0xb8] sm:$0xff]  ;;  %994 = vst [vmem:[%s1754_s20 + $0x98] sm:$0xff] %v738_v61  ;;  %v741_v6 = vadd.f32 %v485_v3, %v229_v1  ;;  %v231_v8 = vld [vmem:[%s1732_s19 + $0xc0] sm:$0xff] }
  0x60   : > { %995 = vst [vmem:[%s1754_s20 + $0xa0] sm:$0xff] %v739_v62  ;;  %v742_v7 = vadd.f32 %v486_v5, %v230_v4  ;;  %v487_v9 = vld [vmem:[%s1739_s29 + $0xc0] sm:$0xff]  ;;  %v232_v10 = vld [vmem:[%s1732_s19 + $0xc8] sm:$0xff]  ;;  %v233_v13 = vld [vmem:[%s1732_s19 + $0xd0] sm:$0xff] }
  0x61   : > { %996 = vst [vmem:[%s1754_s20 + $0xa8] sm:$0xff] %v740_v2  ;;  %v743_v11 = vadd.f32 %v487_v9, %v231_v8  ;;  %v488_v12 = vld [vmem:[%s1739_s29 + $0xc8] sm:$0xff]  ;;  %v489_v14 = vld [vmem:[%s1739_s29 + $0xd0] sm:$0xff]  ;;  %997 = vst [vmem:[%s1754_s20 + $0xb0] sm:$0xff] %v741_v6 }
  0x62   : > { %998 = vst [vmem:[%s1754_s20 + $0xb8] sm:$0xff] %v742_v7  ;;  %v744_v15 = vadd.f32 %v488_v12, %v232_v10  ;;  %v745_v16 = vadd.f32 %v489_v14, %v233_v13  ;;  %v234_v17 = vld [vmem:[%s1732_s19 + $0xd8] sm:$0xff]  ;;  %v235_v19 = vld [vmem:[%s1732_s19 + $0xe0] sm:$0xff]  ;;  %v236_v22 = vld [vmem:[%s1732_s19 + $0xe8] sm:$0xff] }
  0x63   : > { %v490_v18 = vld [vmem:[%s1739_s29 + $0xd8] sm:$0xff]  ;;  %999 = vst [vmem:[%s1754_s20 + $0xc0] sm:$0xff] %v743_v11  ;;  %v491_v21 = vld [vmem:[%s1739_s29 + $0xe0] sm:$0xff]  ;;  %v492_v23 = vld [vmem:[%s1739_s29 + $0xe8] sm:$0xff] }
  0x64   : > { %v746_v20 = vadd.f32 %v490_v18, %v234_v17  ;;  %1000 = vst [vmem:[%s1754_s20 + $0xc8] sm:$0xff] %v744_v15  ;;  %1001 = vst [vmem:[%s1754_s20 + $0xd0] sm:$0xff] %v745_v16  ;;  %v747_v24 = vadd.f32 %v491_v21, %v235_v19  ;;  %v748_v25 = vadd.f32 %v492_v23, %v236_v22  ;;  %v237_v26 = vld [vmem:[%s1732_s19 + $0xf0] sm:$0xff]  ;;  %v238_v28 = vld [vmem:[%s1732_s19 + $0xf8] sm:$0xff] }
  0x65   : > { %v493_v27 = vld [vmem:[%s1739_s29 + $0xf0] sm:$0xff]  ;;  %v494_v30 = vld [vmem:[%s1739_s29 + $0xf8] sm:$0xff]  ;;  %v239_v31 = vld [vmem:[%s1732_s19 + $0x100] sm:$0xff] }
  0x66   : > { %1002 = vst [vmem:[%s1754_s20 + $0xd8] sm:$0xff] %v746_v20  ;;  %v749_v29 = vadd.f32 %v493_v27, %v237_v26  ;;  %v495_v32 = vld [vmem:[%s1739_s29 + $0x100] sm:$0xff]  ;;  %1003 = vst [vmem:[%s1754_s20 + $0xe0] sm:$0xff] %v747_v24  ;;  %v750_v33 = vadd.f32 %v494_v30, %v238_v28  ;;  %v240_v35 = vld [vmem:[%s1732_s19 + $0x108] sm:$0xff] }
  0x67   : > { %1004 = vst [vmem:[%s1754_s20 + $0xe8] sm:$0xff] %v748_v25  ;;  %v751_v34 = vadd.f32 %v495_v32, %v239_v31  ;;  %v496_v36 = vld [vmem:[%s1739_s29 + $0x108] sm:$0xff]  ;;  %v241_v37 = vld [vmem:[%s1732_s19 + $0x110] sm:$0xff]  ;;  %v242_v40 = vld [vmem:[%s1732_s19 + $0x118] sm:$0xff] }
  0x68   : > { %1005 = vst [vmem:[%s1754_s20 + $0xf0] sm:$0xff] %v749_v29  ;;  %v752_v38 = vadd.f32 %v496_v36, %v240_v35  ;;  %v497_v39 = vld [vmem:[%s1739_s29 + $0x110] sm:$0xff]  ;;  %v498_v41 = vld [vmem:[%s1739_s29 + $0x118] sm:$0xff]  ;;  %1006 = vst [vmem:[%s1754_s20 + $0xf8] sm:$0xff] %v750_v33 }
  0x69   : > { %1007 = vst [vmem:[%s1754_s20 + $0x100] sm:$0xff] %v751_v34  ;;  %v753_v42 = vadd.f32 %v497_v39, %v241_v37  ;;  %v754_v43 = vadd.f32 %v498_v41, %v242_v40  ;;  %v243_v44 = vld [vmem:[%s1732_s19 + $0x120] sm:$0xff]  ;;  %v244_v46 = vld [vmem:[%s1732_s19 + $0x128] sm:$0xff]  ;;  %v245_v49 = vld [vmem:[%s1732_s19 + $0x130] sm:$0xff] }
  0x6a   : > { %v499_v45 = vld [vmem:[%s1739_s29 + $0x120] sm:$0xff]  ;;  %1008 = vst [vmem:[%s1754_s20 + $0x108] sm:$0xff] %v752_v38  ;;  %v500_v48 = vld [vmem:[%s1739_s29 + $0x128] sm:$0xff]  ;;  %v501_v50 = vld [vmem:[%s1739_s29 + $0x130] sm:$0xff] }
  0x6b   : > { %v755_v47 = vadd.f32 %v499_v45, %v243_v44  ;;  %1009 = vst [vmem:[%s1754_s20 + $0x110] sm:$0xff] %v753_v42  ;;  %1010 = vst [vmem:[%s1754_s20 + $0x118] sm:$0xff] %v754_v43  ;;  %v756_v51 = vadd.f32 %v500_v48, %v244_v46  ;;  %v757_v52 = vadd.f32 %v501_v50, %v245_v49  ;;  %v246_v53 = vld [vmem:[%s1732_s19 + $0x138] sm:$0xff]  ;;  %v247_v55 = vld [vmem:[%s1732_s19 + $0x140] sm:$0xff] }
  0x6c   : > { %v502_v54 = vld [vmem:[%s1739_s29 + $0x138] sm:$0xff]  ;;  %v503_v57 = vld [vmem:[%s1739_s29 + $0x140] sm:$0xff]  ;;  %v248_v58 = vld [vmem:[%s1732_s19 + $0x148] sm:$0xff] }
  0x6d   : > { %1011 = vst [vmem:[%s1754_s20 + $0x120] sm:$0xff] %v755_v47  ;;  %v758_v56 = vadd.f32 %v502_v54, %v246_v53  ;;  %v504_v59 = vld [vmem:[%s1739_s29 + $0x148] sm:$0xff]  ;;  %1012 = vst [vmem:[%s1754_s20 + $0x128] sm:$0xff] %v756_v51  ;;  %v759_v60 = vadd.f32 %v503_v57, %v247_v55  ;;  %v249_v62 = vld [vmem:[%s1732_s19 + $0x150] sm:$0xff] }
  0x6e   : > { %1013 = vst [vmem:[%s1754_s20 + $0x130] sm:$0xff] %v757_v52  ;;  %v760_v61 = vadd.f32 %v504_v59, %v248_v58  ;;  %v505_v63 = vld [vmem:[%s1739_s29 + $0x150] sm:$0xff]  ;;  %v250_v0 = vld [vmem:[%s1732_s19 + $0x158] sm:$0xff]  ;;  %v251_v3 = vld [vmem:[%s1732_s19 + $0x160] sm:$0xff] }
  0x6f   : > { %1014 = vst [vmem:[%s1754_s20 + $0x138] sm:$0xff] %v758_v56  ;;  %v761_v1 = vadd.f32 %v505_v63, %v249_v62  ;;  %v506_v2 = vld [vmem:[%s1739_s29 + $0x158] sm:$0xff]  ;;  %v507_v4 = vld [vmem:[%s1739_s29 + $0x160] sm:$0xff]  ;;  %1015 = vst [vmem:[%s1754_s20 + $0x140] sm:$0xff] %v759_v60 }
  0x70   : > { %1016 = vst [vmem:[%s1754_s20 + $0x148] sm:$0xff] %v760_v61  ;;  %v762_v5 = vadd.f32 %v506_v2, %v250_v0  ;;  %v763_v6 = vadd.f32 %v507_v4, %v251_v3  ;;  %v252_v7 = vld [vmem:[%s1732_s19 + $0x168] sm:$0xff]  ;;  %v253_v9 = vld [vmem:[%s1732_s19 + $0x170] sm:$0xff]  ;;  %v254_v12 = vld [vmem:[%s1732_s19 + $0x178] sm:$0xff] }
  0x71   : > { %v508_v8 = vld [vmem:[%s1739_s29 + $0x168] sm:$0xff]  ;;  %1017 = vst [vmem:[%s1754_s20 + $0x150] sm:$0xff] %v761_v1  ;;  %v509_v11 = vld [vmem:[%s1739_s29 + $0x170] sm:$0xff]  ;;  %v510_v13 = vld [vmem:[%s1739_s29 + $0x178] sm:$0xff] }
  0x72   : > { %v764_v10 = vadd.f32 %v508_v8, %v252_v7  ;;  %1018 = vst [vmem:[%s1754_s20 + $0x158] sm:$0xff] %v762_v5  ;;  %1019 = vst [vmem:[%s1754_s20 + $0x160] sm:$0xff] %v763_v6  ;;  %v765_v14 = vadd.f32 %v509_v11, %v253_v9  ;;  %v766_v15 = vadd.f32 %v510_v13, %v254_v12  ;;  %v255_v16 = vld [vmem:[%s1732_s19 + $0x180] sm:$0xff]  ;;  %v256_v18 = vld [vmem:[%s1732_s19 + $0x188] sm:$0xff] }
  0x73   : > { %v511_v17 = vld [vmem:[%s1739_s29 + $0x180] sm:$0xff]  ;;  %v512_v20 = vld [vmem:[%s1739_s29 + $0x188] sm:$0xff]  ;;  %v257_v21 = vld [vmem:[%s1732_s19 + $0x190] sm:$0xff] }
  0x74   : > { %1020 = vst [vmem:[%s1754_s20 + $0x168] sm:$0xff] %v764_v10  ;;  %v767_v19 = vadd.f32 %v511_v17, %v255_v16  ;;  %v513_v22 = vld [vmem:[%s1739_s29 + $0x190] sm:$0xff]  ;;  %1021 = vst [vmem:[%s1754_s20 + $0x170] sm:$0xff] %v765_v14  ;;  %v768_v23 = vadd.f32 %v512_v20, %v256_v18  ;;  %v258_v25 = vld [vmem:[%s1732_s19 + $0x198] sm:$0xff] }
  0x75   : > { %1022 = vst [vmem:[%s1754_s20 + $0x178] sm:$0xff] %v766_v15  ;;  %v769_v24 = vadd.f32 %v513_v22, %v257_v21  ;;  %v514_v26 = vld [vmem:[%s1739_s29 + $0x198] sm:$0xff]  ;;  %v259_v27 = vld [vmem:[%s1732_s19 + $0x1a0] sm:$0xff]  ;;  %v260_v30 = vld [vmem:[%s1732_s19 + $0x1a8] sm:$0xff] }
  0x76   : > { %1023 = vst [vmem:[%s1754_s20 + $0x180] sm:$0xff] %v767_v19  ;;  %v770_v28 = vadd.f32 %v514_v26, %v258_v25  ;;  %v515_v29 = vld [vmem:[%s1739_s29 + $0x1a0] sm:$0xff]  ;;  %v516_v31 = vld [vmem:[%s1739_s29 + $0x1a8] sm:$0xff]  ;;  %1024 = vst [vmem:[%s1754_s20 + $0x188] sm:$0xff] %v768_v23 }
  0x77   : > { %1025 = vst [vmem:[%s1754_s20 + $0x190] sm:$0xff] %v769_v24  ;;  %v771_v32 = vadd.f32 %v515_v29, %v259_v27  ;;  %v772_v33 = vadd.f32 %v516_v31, %v260_v30  ;;  %v261_v34 = vld [vmem:[%s1732_s19 + $0x1b0] sm:$0xff]  ;;  %v262_v36 = vld [vmem:[%s1732_s19 + $0x1b8] sm:$0xff]  ;;  %v263_v39 = vld [vmem:[%s1732_s19 + $0x1c0] sm:$0xff] }
  0x78   : > { %v517_v35 = vld [vmem:[%s1739_s29 + $0x1b0] sm:$0xff]  ;;  %1026 = vst [vmem:[%s1754_s20 + $0x198] sm:$0xff] %v770_v28  ;;  %v518_v38 = vld [vmem:[%s1739_s29 + $0x1b8] sm:$0xff]  ;;  %v519_v40 = vld [vmem:[%s1739_s29 + $0x1c0] sm:$0xff] }
  0x79   : > { %v773_v37 = vadd.f32 %v517_v35, %v261_v34  ;;  %1027 = vst [vmem:[%s1754_s20 + $0x1a0] sm:$0xff] %v771_v32  ;;  %1028 = vst [vmem:[%s1754_s20 + $0x1a8] sm:$0xff] %v772_v33  ;;  %v774_v41 = vadd.f32 %v518_v38, %v262_v36  ;;  %v775_v42 = vadd.f32 %v519_v40, %v263_v39  ;;  %v264_v43 = vld [vmem:[%s1732_s19 + $0x1c8] sm:$0xff]  ;;  %v265_v45 = vld [vmem:[%s1732_s19 + $0x1d0] sm:$0xff] }
  0x7a   : > { %v520_v44 = vld [vmem:[%s1739_s29 + $0x1c8] sm:$0xff]  ;;  %v521_v47 = vld [vmem:[%s1739_s29 + $0x1d0] sm:$0xff]  ;;  %v266_v48 = vld [vmem:[%s1732_s19 + $0x1d8] sm:$0xff] }
  0x7b   : > { %1029 = vst [vmem:[%s1754_s20 + $0x1b0] sm:$0xff] %v773_v37  ;;  %v776_v46 = vadd.f32 %v520_v44, %v264_v43  ;;  %v522_v49 = vld [vmem:[%s1739_s29 + $0x1d8] sm:$0xff]  ;;  %1030 = vst [vmem:[%s1754_s20 + $0x1b8] sm:$0xff] %v774_v41  ;;  %v777_v50 = vadd.f32 %v521_v47, %v265_v45  ;;  %v267_v52 = vld [vmem:[%s1732_s19 + $0x1e0] sm:$0xff] }
  0x7c   : > { %1031 = vst [vmem:[%s1754_s20 + $0x1c0] sm:$0xff] %v775_v42  ;;  %v778_v51 = vadd.f32 %v522_v49, %v266_v48  ;;  %v523_v53 = vld [vmem:[%s1739_s29 + $0x1e0] sm:$0xff]  ;;  %v268_v54 = vld [vmem:[%s1732_s19 + $0x1e8] sm:$0xff]  ;;  %v269_v57 = vld [vmem:[%s1732_s19 + $0x1f0] sm:$0xff] }
  0x7d   : > { %1032 = vst [vmem:[%s1754_s20 + $0x1c8] sm:$0xff] %v776_v46  ;;  %v779_v55 = vadd.f32 %v523_v53, %v267_v52  ;;  %v524_v56 = vld [vmem:[%s1739_s29 + $0x1e8] sm:$0xff]  ;;  %v525_v58 = vld [vmem:[%s1739_s29 + $0x1f0] sm:$0xff]  ;;  %1033 = vst [vmem:[%s1754_s20 + $0x1d0] sm:$0xff] %v777_v50 }
  0x7e   : > { %1034 = vst [vmem:[%s1754_s20 + $0x1d8] sm:$0xff] %v778_v51  ;;  %v780_v59 = vadd.f32 %v524_v56, %v268_v54  ;;  %v781_v60 = vadd.f32 %v525_v58, %v269_v57  ;;  %v270_v61 = vld [vmem:[%s1732_s19 + $0x1f8] sm:$0xff]  ;;  %v271_v63 = vld [vmem:[%s1732_s19 + $0x200] sm:$0xff]  ;;  %v272_v2 = vld [vmem:[%s1732_s19 + $0x208] sm:$0xff] }
  0x7f   : > { %v526_v62 = vld [vmem:[%s1739_s29 + $0x1f8] sm:$0xff]  ;;  %1035 = vst [vmem:[%s1754_s20 + $0x1e0] sm:$0xff] %v779_v55  ;;  %v527_v1 = vld [vmem:[%s1739_s29 + $0x200] sm:$0xff]  ;;  %v528_v3 = vld [vmem:[%s1739_s29 + $0x208] sm:$0xff] }
  0x80   : > { %v782_v0 = vadd.f32 %v526_v62, %v270_v61  ;;  %1036 = vst [vmem:[%s1754_s20 + $0x1e8] sm:$0xff] %v780_v59  ;;  %1037 = vst [vmem:[%s1754_s20 + $0x1f0] sm:$0xff] %v781_v60  ;;  %v783_v4 = vadd.f32 %v527_v1, %v271_v63  ;;  %v784_v5 = vadd.f32 %v528_v3, %v272_v2  ;;  %v273_v6 = vld [vmem:[%s1732_s19 + $0x210] sm:$0xff]  ;;  %v274_v8 = vld [vmem:[%s1732_s19 + $0x218] sm:$0xff] }
  0x81   : > { %v529_v7 = vld [vmem:[%s1739_s29 + $0x210] sm:$0xff]  ;;  %v530_v10 = vld [vmem:[%s1739_s29 + $0x218] sm:$0xff]  ;;  %v275_v11 = vld [vmem:[%s1732_s19 + $0x220] sm:$0xff] }
  0x82   : > { %1038 = vst [vmem:[%s1754_s20 + $0x1f8] sm:$0xff] %v782_v0  ;;  %v785_v9 = vadd.f32 %v529_v7, %v273_v6  ;;  %v531_v12 = vld [vmem:[%s1739_s29 + $0x220] sm:$0xff]  ;;  %1039 = vst [vmem:[%s1754_s20 + $0x200] sm:$0xff] %v783_v4  ;;  %v786_v13 = vadd.f32 %v530_v10, %v274_v8  ;;  %v276_v15 = vld [vmem:[%s1732_s19 + $0x228] sm:$0xff] }
  0x83   : > { %1040 = vst [vmem:[%s1754_s20 + $0x208] sm:$0xff] %v784_v5  ;;  %v787_v14 = vadd.f32 %v531_v12, %v275_v11  ;;  %v532_v16 = vld [vmem:[%s1739_s29 + $0x228] sm:$0xff]  ;;  %v277_v17 = vld [vmem:[%s1732_s19 + $0x230] sm:$0xff]  ;;  %v278_v20 = vld [vmem:[%s1732_s19 + $0x238] sm:$0xff] }
  0x84   : > { %1041 = vst [vmem:[%s1754_s20 + $0x210] sm:$0xff] %v785_v9  ;;  %v788_v18 = vadd.f32 %v532_v16, %v276_v15  ;;  %v533_v19 = vld [vmem:[%s1739_s29 + $0x230] sm:$0xff]  ;;  %v534_v21 = vld [vmem:[%s1739_s29 + $0x238] sm:$0xff]  ;;  %1042 = vst [vmem:[%s1754_s20 + $0x218] sm:$0xff] %v786_v13 }
  0x85   : > { %1043 = vst [vmem:[%s1754_s20 + $0x220] sm:$0xff] %v787_v14  ;;  %v789_v22 = vadd.f32 %v533_v19, %v277_v17  ;;  %v790_v23 = vadd.f32 %v534_v21, %v278_v20  ;;  %v279_v24 = vld [vmem:[%s1732_s19 + $0x240] sm:$0xff]  ;;  %v280_v26 = vld [vmem:[%s1732_s19 + $0x248] sm:$0xff]  ;;  %v281_v29 = vld [vmem:[%s1732_s19 + $0x250] sm:$0xff] }
  0x86   : > { %v535_v25 = vld [vmem:[%s1739_s29 + $0x240] sm:$0xff]  ;;  %1044 = vst [vmem:[%s1754_s20 + $0x228] sm:$0xff] %v788_v18  ;;  %v536_v28 = vld [vmem:[%s1739_s29 + $0x248] sm:$0xff]  ;;  %v537_v30 = vld [vmem:[%s1739_s29 + $0x250] sm:$0xff] }
  0x87   : > { %v791_v27 = vadd.f32 %v535_v25, %v279_v24  ;;  %1045 = vst [vmem:[%s1754_s20 + $0x230] sm:$0xff] %v789_v22  ;;  %1046 = vst [vmem:[%s1754_s20 + $0x238] sm:$0xff] %v790_v23  ;;  %v792_v31 = vadd.f32 %v536_v28, %v280_v26  ;;  %v793_v32 = vadd.f32 %v537_v30, %v281_v29  ;;  %v282_v33 = vld [vmem:[%s1732_s19 + $0x258] sm:$0xff]  ;;  %v283_v35 = vld [vmem:[%s1732_s19 + $0x260] sm:$0xff] }
  0x88   : > { %v538_v34 = vld [vmem:[%s1739_s29 + $0x258] sm:$0xff]  ;;  %v539_v37 = vld [vmem:[%s1739_s29 + $0x260] sm:$0xff]  ;;  %v284_v38 = vld [vmem:[%s1732_s19 + $0x268] sm:$0xff] }
  0x89   : > { %1047 = vst [vmem:[%s1754_s20 + $0x240] sm:$0xff] %v791_v27  ;;  %v794_v36 = vadd.f32 %v538_v34, %v282_v33  ;;  %v540_v39 = vld [vmem:[%s1739_s29 + $0x268] sm:$0xff]  ;;  %1048 = vst [vmem:[%s1754_s20 + $0x248] sm:$0xff] %v792_v31  ;;  %v795_v40 = vadd.f32 %v539_v37, %v283_v35  ;;  %v285_v42 = vld [vmem:[%s1732_s19 + $0x270] sm:$0xff] }
  0x8a   : > { %1049 = vst [vmem:[%s1754_s20 + $0x250] sm:$0xff] %v793_v32  ;;  %v796_v41 = vadd.f32 %v540_v39, %v284_v38  ;;  %v541_v43 = vld [vmem:[%s1739_s29 + $0x270] sm:$0xff]  ;;  %v286_v44 = vld [vmem:[%s1732_s19 + $0x278] sm:$0xff]  ;;  %v287_v47 = vld [vmem:[%s1732_s19 + $0x280] sm:$0xff] }
  0x8b   : > { %1050 = vst [vmem:[%s1754_s20 + $0x258] sm:$0xff] %v794_v36  ;;  %v797_v45 = vadd.f32 %v541_v43, %v285_v42  ;;  %v542_v46 = vld [vmem:[%s1739_s29 + $0x278] sm:$0xff]  ;;  %v543_v48 = vld [vmem:[%s1739_s29 + $0x280] sm:$0xff]  ;;  %1051 = vst [vmem:[%s1754_s20 + $0x260] sm:$0xff] %v795_v40 }
  0x8c   : > { %1052 = vst [vmem:[%s1754_s20 + $0x268] sm:$0xff] %v796_v41  ;;  %v798_v49 = vadd.f32 %v542_v46, %v286_v44  ;;  %v799_v50 = vadd.f32 %v543_v48, %v287_v47  ;;  %v288_v51 = vld [vmem:[%s1732_s19 + $0x288] sm:$0xff]  ;;  %v289_v53 = vld [vmem:[%s1732_s19 + $0x290] sm:$0xff]  ;;  %v290_v56 = vld [vmem:[%s1732_s19 + $0x298] sm:$0xff] }
  0x8d   : > { %v544_v52 = vld [vmem:[%s1739_s29 + $0x288] sm:$0xff]  ;;  %1053 = vst [vmem:[%s1754_s20 + $0x270] sm:$0xff] %v797_v45  ;;  %v545_v55 = vld [vmem:[%s1739_s29 + $0x290] sm:$0xff]  ;;  %v546_v57 = vld [vmem:[%s1739_s29 + $0x298] sm:$0xff] }
  0x8e   : > { %v800_v54 = vadd.f32 %v544_v52, %v288_v51  ;;  %1054 = vst [vmem:[%s1754_s20 + $0x278] sm:$0xff] %v798_v49  ;;  %1055 = vst [vmem:[%s1754_s20 + $0x280] sm:$0xff] %v799_v50  ;;  %v801_v58 = vadd.f32 %v545_v55, %v289_v53  ;;  %v802_v59 = vadd.f32 %v546_v57, %v290_v56  ;;  %v291_v60 = vld [vmem:[%s1732_s19 + $0x2a0] sm:$0xff]  ;;  %v292_v62 = vld [vmem:[%s1732_s19 + $0x2a8] sm:$0xff] }
  0x8f   : > { %v547_v61 = vld [vmem:[%s1739_s29 + $0x2a0] sm:$0xff]  ;;  %v548_v0 = vld [vmem:[%s1739_s29 + $0x2a8] sm:$0xff]  ;;  %v293_v1 = vld [vmem:[%s1732_s19 + $0x2b0] sm:$0xff] }
  0x90   : > { %1056 = vst [vmem:[%s1754_s20 + $0x288] sm:$0xff] %v800_v54  ;;  %v803_v63 = vadd.f32 %v547_v61, %v291_v60  ;;  %v549_v2 = vld [vmem:[%s1739_s29 + $0x2b0] sm:$0xff]  ;;  %1057 = vst [vmem:[%s1754_s20 + $0x290] sm:$0xff] %v801_v58  ;;  %v804_v3 = vadd.f32 %v548_v0, %v292_v62  ;;  %v294_v5 = vld [vmem:[%s1732_s19 + $0x2b8] sm:$0xff] }
  0x91   : > { %1058 = vst [vmem:[%s1754_s20 + $0x298] sm:$0xff] %v802_v59  ;;  %v805_v4 = vadd.f32 %v549_v2, %v293_v1  ;;  %v550_v6 = vld [vmem:[%s1739_s29 + $0x2b8] sm:$0xff]  ;;  %v295_v7 = vld [vmem:[%s1732_s19 + $0x2c0] sm:$0xff]  ;;  %v296_v10 = vld [vmem:[%s1732_s19 + $0x2c8] sm:$0xff] }
  0x92   : > { %1059 = vst [vmem:[%s1754_s20 + $0x2a0] sm:$0xff] %v803_v63  ;;  %v806_v8 = vadd.f32 %v550_v6, %v294_v5  ;;  %v551_v9 = vld [vmem:[%s1739_s29 + $0x2c0] sm:$0xff]  ;;  %v552_v11 = vld [vmem:[%s1739_s29 + $0x2c8] sm:$0xff]  ;;  %1060 = vst [vmem:[%s1754_s20 + $0x2a8] sm:$0xff] %v804_v3 }
  0x93   : > { %1061 = vst [vmem:[%s1754_s20 + $0x2b0] sm:$0xff] %v805_v4  ;;  %v807_v12 = vadd.f32 %v551_v9, %v295_v7  ;;  %v808_v13 = vadd.f32 %v552_v11, %v296_v10  ;;  %v297_v14 = vld [vmem:[%s1732_s19 + $0x2d0] sm:$0xff]  ;;  %v298_v16 = vld [vmem:[%s1732_s19 + $0x2d8] sm:$0xff]  ;;  %v299_v19 = vld [vmem:[%s1732_s19 + $0x2e0] sm:$0xff] }
  0x94   : > { %v553_v15 = vld [vmem:[%s1739_s29 + $0x2d0] sm:$0xff]  ;;  %1062 = vst [vmem:[%s1754_s20 + $0x2b8] sm:$0xff] %v806_v8  ;;  %v554_v18 = vld [vmem:[%s1739_s29 + $0x2d8] sm:$0xff]  ;;  %v555_v20 = vld [vmem:[%s1739_s29 + $0x2e0] sm:$0xff] }
  0x95   : > { %v809_v17 = vadd.f32 %v553_v15, %v297_v14  ;;  %1063 = vst [vmem:[%s1754_s20 + $0x2c0] sm:$0xff] %v807_v12  ;;  %1064 = vst [vmem:[%s1754_s20 + $0x2c8] sm:$0xff] %v808_v13  ;;  %v810_v21 = vadd.f32 %v554_v18, %v298_v16  ;;  %v811_v22 = vadd.f32 %v555_v20, %v299_v19  ;;  %v300_v23 = vld [vmem:[%s1732_s19 + $0x2e8] sm:$0xff]  ;;  %v301_v25 = vld [vmem:[%s1732_s19 + $0x2f0] sm:$0xff] }
  0x96   : > { %v556_v24 = vld [vmem:[%s1739_s29 + $0x2e8] sm:$0xff]  ;;  %v557_v27 = vld [vmem:[%s1739_s29 + $0x2f0] sm:$0xff]  ;;  %v302_v28 = vld [vmem:[%s1732_s19 + $0x2f8] sm:$0xff] }
  0x97   : > { %1065 = vst [vmem:[%s1754_s20 + $0x2d0] sm:$0xff] %v809_v17  ;;  %v812_v26 = vadd.f32 %v556_v24, %v300_v23  ;;  %v558_v29 = vld [vmem:[%s1739_s29 + $0x2f8] sm:$0xff]  ;;  %1066 = vst [vmem:[%s1754_s20 + $0x2d8] sm:$0xff] %v810_v21  ;;  %v813_v30 = vadd.f32 %v557_v27, %v301_v25  ;;  %v303_v32 = vld [vmem:[%s1732_s19 + $0x300] sm:$0xff] }
  0x98   : > { %1067 = vst [vmem:[%s1754_s20 + $0x2e0] sm:$0xff] %v811_v22  ;;  %v814_v31 = vadd.f32 %v558_v29, %v302_v28  ;;  %v559_v33 = vld [vmem:[%s1739_s29 + $0x300] sm:$0xff]  ;;  %v304_v34 = vld [vmem:[%s1732_s19 + $0x308] sm:$0xff]  ;;  %v305_v37 = vld [vmem:[%s1732_s19 + $0x310] sm:$0xff] }
  0x99   : > { %1068 = vst [vmem:[%s1754_s20 + $0x2e8] sm:$0xff] %v812_v26  ;;  %v815_v35 = vadd.f32 %v559_v33, %v303_v32  ;;  %v560_v36 = vld [vmem:[%s1739_s29 + $0x308] sm:$0xff]  ;;  %v561_v38 = vld [vmem:[%s1739_s29 + $0x310] sm:$0xff]  ;;  %1069 = vst [vmem:[%s1754_s20 + $0x2f0] sm:$0xff] %v813_v30 }
  0x9a   : > { %1070 = vst [vmem:[%s1754_s20 + $0x2f8] sm:$0xff] %v814_v31  ;;  %v816_v39 = vadd.f32 %v560_v36, %v304_v34  ;;  %v817_v40 = vadd.f32 %v561_v38, %v305_v37  ;;  %v306_v41 = vld [vmem:[%s1732_s19 + $0x318] sm:$0xff]  ;;  %v307_v43 = vld [vmem:[%s1732_s19 + $0x320] sm:$0xff]  ;;  %v308_v46 = vld [vmem:[%s1732_s19 + $0x328] sm:$0xff] }
  0x9b   : > { %v562_v42 = vld [vmem:[%s1739_s29 + $0x318] sm:$0xff]  ;;  %1071 = vst [vmem:[%s1754_s20 + $0x300] sm:$0xff] %v815_v35  ;;  %v563_v45 = vld [vmem:[%s1739_s29 + $0x320] sm:$0xff]  ;;  %v564_v47 = vld [vmem:[%s1739_s29 + $0x328] sm:$0xff] }
  0x9c   : > { %v818_v44 = vadd.f32 %v562_v42, %v306_v41  ;;  %1072 = vst [vmem:[%s1754_s20 + $0x308] sm:$0xff] %v816_v39  ;;  %1073 = vst [vmem:[%s1754_s20 + $0x310] sm:$0xff] %v817_v40  ;;  %v819_v48 = vadd.f32 %v563_v45, %v307_v43  ;;  %v820_v49 = vadd.f32 %v564_v47, %v308_v46  ;;  %v309_v50 = vld [vmem:[%s1732_s19 + $0x330] sm:$0xff]  ;;  %v310_v52 = vld [vmem:[%s1732_s19 + $0x338] sm:$0xff] }
  0x9d   : > { %v565_v51 = vld [vmem:[%s1739_s29 + $0x330] sm:$0xff]  ;;  %v566_v54 = vld [vmem:[%s1739_s29 + $0x338] sm:$0xff]  ;;  %v311_v55 = vld [vmem:[%s1732_s19 + $0x340] sm:$0xff] }
  0x9e   : > { %1074 = vst [vmem:[%s1754_s20 + $0x318] sm:$0xff] %v818_v44  ;;  %v821_v53 = vadd.f32 %v565_v51, %v309_v50  ;;  %v567_v56 = vld [vmem:[%s1739_s29 + $0x340] sm:$0xff]  ;;  %1075 = vst [vmem:[%s1754_s20 + $0x320] sm:$0xff] %v819_v48  ;;  %v822_v57 = vadd.f32 %v566_v54, %v310_v52  ;;  %v312_v59 = vld [vmem:[%s1732_s19 + $0x348] sm:$0xff] }
  0x9f   : > { %1076 = vst [vmem:[%s1754_s20 + $0x328] sm:$0xff] %v820_v49  ;;  %v823_v58 = vadd.f32 %v567_v56, %v311_v55  ;;  %v568_v60 = vld [vmem:[%s1739_s29 + $0x348] sm:$0xff]  ;;  %v313_v61 = vld [vmem:[%s1732_s19 + $0x350] sm:$0xff]  ;;  %v314_v0 = vld [vmem:[%s1732_s19 + $0x358] sm:$0xff] }
  0xa0   : > { %1077 = vst [vmem:[%s1754_s20 + $0x330] sm:$0xff] %v821_v53  ;;  %v824_v62 = vadd.f32 %v568_v60, %v312_v59  ;;  %v569_v63 = vld [vmem:[%s1739_s29 + $0x350] sm:$0xff]  ;;  %v570_v1 = vld [vmem:[%s1739_s29 + $0x358] sm:$0xff]  ;;  %1078 = vst [vmem:[%s1754_s20 + $0x338] sm:$0xff] %v822_v57 }
  0xa1   : > { %1079 = vst [vmem:[%s1754_s20 + $0x340] sm:$0xff] %v823_v58  ;;  %v825_v2 = vadd.f32 %v569_v63, %v313_v61  ;;  %v826_v3 = vadd.f32 %v570_v1, %v314_v0  ;;  %v315_v4 = vld [vmem:[%s1732_s19 + $0x360] sm:$0xff]  ;;  %v316_v6 = vld [vmem:[%s1732_s19 + $0x368] sm:$0xff]  ;;  %v317_v9 = vld [vmem:[%s1732_s19 + $0x370] sm:$0xff] }
  0xa2   : > { %v571_v5 = vld [vmem:[%s1739_s29 + $0x360] sm:$0xff]  ;;  %1080 = vst [vmem:[%s1754_s20 + $0x348] sm:$0xff] %v824_v62  ;;  %v572_v8 = vld [vmem:[%s1739_s29 + $0x368] sm:$0xff]  ;;  %v573_v10 = vld [vmem:[%s1739_s29 + $0x370] sm:$0xff] }
  0xa3   : > { %v827_v7 = vadd.f32 %v571_v5, %v315_v4  ;;  %1081 = vst [vmem:[%s1754_s20 + $0x350] sm:$0xff] %v825_v2  ;;  %1082 = vst [vmem:[%s1754_s20 + $0x358] sm:$0xff] %v826_v3  ;;  %v828_v11 = vadd.f32 %v572_v8, %v316_v6  ;;  %v829_v12 = vadd.f32 %v573_v10, %v317_v9  ;;  %v318_v13 = vld [vmem:[%s1732_s19 + $0x378] sm:$0xff]  ;;  %v319_v15 = vld [vmem:[%s1732_s19 + $0x380] sm:$0xff] }
  0xa4   : > { %v574_v14 = vld [vmem:[%s1739_s29 + $0x378] sm:$0xff]  ;;  %v575_v17 = vld [vmem:[%s1739_s29 + $0x380] sm:$0xff]  ;;  %v320_v18 = vld [vmem:[%s1732_s19 + $0x388] sm:$0xff] }
  0xa5   : > { %1083 = vst [vmem:[%s1754_s20 + $0x360] sm:$0xff] %v827_v7  ;;  %v830_v16 = vadd.f32 %v574_v14, %v318_v13  ;;  %v576_v19 = vld [vmem:[%s1739_s29 + $0x388] sm:$0xff]  ;;  %1084 = vst [vmem:[%s1754_s20 + $0x368] sm:$0xff] %v828_v11  ;;  %v831_v20 = vadd.f32 %v575_v17, %v319_v15  ;;  %v321_v22 = vld [vmem:[%s1732_s19 + $0x390] sm:$0xff] }
  0xa6   : > { %1085 = vst [vmem:[%s1754_s20 + $0x370] sm:$0xff] %v829_v12  ;;  %v832_v21 = vadd.f32 %v576_v19, %v320_v18  ;;  %v577_v23 = vld [vmem:[%s1739_s29 + $0x390] sm:$0xff]  ;;  %v322_v24 = vld [vmem:[%s1732_s19 + $0x398] sm:$0xff]  ;;  %v323_v27 = vld [vmem:[%s1732_s19 + $0x3a0] sm:$0xff] }
  0xa7   : > { %1086 = vst [vmem:[%s1754_s20 + $0x378] sm:$0xff] %v830_v16  ;;  %v833_v25 = vadd.f32 %v577_v23, %v321_v22  ;;  %v578_v26 = vld [vmem:[%s1739_s29 + $0x398] sm:$0xff]  ;;  %v579_v28 = vld [vmem:[%s1739_s29 + $0x3a0] sm:$0xff]  ;;  %1087 = vst [vmem:[%s1754_s20 + $0x380] sm:$0xff] %v831_v20 }
  0xa8   : > { %1088 = vst [vmem:[%s1754_s20 + $0x388] sm:$0xff] %v832_v21  ;;  %v834_v29 = vadd.f32 %v578_v26, %v322_v24  ;;  %v835_v30 = vadd.f32 %v579_v28, %v323_v27  ;;  %v324_v31 = vld [vmem:[%s1732_s19 + $0x3a8] sm:$0xff]  ;;  %v325_v33 = vld [vmem:[%s1732_s19 + $0x3b0] sm:$0xff]  ;;  %v326_v36 = vld [vmem:[%s1732_s19 + $0x3b8] sm:$0xff] }
  0xa9   : > { %v580_v32 = vld [vmem:[%s1739_s29 + $0x3a8] sm:$0xff]  ;;  %1089 = vst [vmem:[%s1754_s20 + $0x390] sm:$0xff] %v833_v25  ;;  %v581_v35 = vld [vmem:[%s1739_s29 + $0x3b0] sm:$0xff]  ;;  %v582_v37 = vld [vmem:[%s1739_s29 + $0x3b8] sm:$0xff] }
  0xaa   : > { %v836_v34 = vadd.f32 %v580_v32, %v324_v31  ;;  %1090 = vst [vmem:[%s1754_s20 + $0x398] sm:$0xff] %v834_v29  ;;  %1091 = vst [vmem:[%s1754_s20 + $0x3a0] sm:$0xff] %v835_v30  ;;  %v837_v38 = vadd.f32 %v581_v35, %v325_v33  ;;  %v838_v39 = vadd.f32 %v582_v37, %v326_v36  ;;  %v327_v40 = vld [vmem:[%s1732_s19 + $0x3c0] sm:$0xff]  ;;  %v328_v42 = vld [vmem:[%s1732_s19 + $0x3c8] sm:$0xff] }
  0xab   : > { %v583_v41 = vld [vmem:[%s1739_s29 + $0x3c0] sm:$0xff]  ;;  %v584_v44 = vld [vmem:[%s1739_s29 + $0x3c8] sm:$0xff]  ;;  %v329_v45 = vld [vmem:[%s1732_s19 + $0x3d0] sm:$0xff] }
  0xac   : > { %1092 = vst [vmem:[%s1754_s20 + $0x3a8] sm:$0xff] %v836_v34  ;;  %v839_v43 = vadd.f32 %v583_v41, %v327_v40  ;;  %v585_v46 = vld [vmem:[%s1739_s29 + $0x3d0] sm:$0xff]  ;;  %1093 = vst [vmem:[%s1754_s20 + $0x3b0] sm:$0xff] %v837_v38  ;;  %v840_v47 = vadd.f32 %v584_v44, %v328_v42  ;;  %v330_v49 = vld [vmem:[%s1732_s19 + $0x3d8] sm:$0xff] }
  0xad   : > { %1094 = vst [vmem:[%s1754_s20 + $0x3b8] sm:$0xff] %v838_v39  ;;  %v841_v48 = vadd.f32 %v585_v46, %v329_v45  ;;  %v586_v50 = vld [vmem:[%s1739_s29 + $0x3d8] sm:$0xff]  ;;  %v331_v51 = vld [vmem:[%s1732_s19 + $0x3e0] sm:$0xff]  ;;  %v332_v54 = vld [vmem:[%s1732_s19 + $0x3e8] sm:$0xff] }
  0xae   : > { %1095 = vst [vmem:[%s1754_s20 + $0x3c0] sm:$0xff] %v839_v43  ;;  %v842_v52 = vadd.f32 %v586_v50, %v330_v49  ;;  %v587_v53 = vld [vmem:[%s1739_s29 + $0x3e0] sm:$0xff]  ;;  %v588_v55 = vld [vmem:[%s1739_s29 + $0x3e8] sm:$0xff]  ;;  %1096 = vst [vmem:[%s1754_s20 + $0x3c8] sm:$0xff] %v840_v47 }
  0xaf   : > { %1097 = vst [vmem:[%s1754_s20 + $0x3d0] sm:$0xff] %v841_v48  ;;  %v843_v56 = vadd.f32 %v587_v53, %v331_v51  ;;  %v844_v57 = vadd.f32 %v588_v55, %v332_v54  ;;  %v333_v58 = vld [vmem:[%s1732_s19 + $0x3f0] sm:$0xff]  ;;  %v334_v60 = vld [vmem:[%s1732_s19 + $0x3f8] sm:$0xff]  ;;  %v335_v63 = vld [vmem:[%s1732_s19 + $0x400] sm:$0xff] }
  0xb0   : > { %v589_v59 = vld [vmem:[%s1739_s29 + $0x3f0] sm:$0xff]  ;;  %1098 = vst [vmem:[%s1754_s20 + $0x3d8] sm:$0xff] %v842_v52  ;;  %v590_v62 = vld [vmem:[%s1739_s29 + $0x3f8] sm:$0xff]  ;;  %v591_v0 = vld [vmem:[%s1739_s29 + $0x400] sm:$0xff] }
  0xb1   : > { %v845_v61 = vadd.f32 %v589_v59, %v333_v58  ;;  %1099 = vst [vmem:[%s1754_s20 + $0x3e0] sm:$0xff] %v843_v56  ;;  %1100 = vst [vmem:[%s1754_s20 + $0x3e8] sm:$0xff] %v844_v57  ;;  %v846_v1 = vadd.f32 %v590_v62, %v334_v60  ;;  %v847_v2 = vadd.f32 %v591_v0, %v335_v63  ;;  %v336_v3 = vld [vmem:[%s1732_s19 + $0x408] sm:$0xff]  ;;  %v337_v5 = vld [vmem:[%s1732_s19 + $0x410] sm:$0xff] }
  0xb2   : > { %v592_v4 = vld [vmem:[%s1739_s29 + $0x408] sm:$0xff]  ;;  %v593_v7 = vld [vmem:[%s1739_s29 + $0x410] sm:$0xff]  ;;  %v338_v8 = vld [vmem:[%s1732_s19 + $0x418] sm:$0xff] }
  0xb3   : > { %1101 = vst [vmem:[%s1754_s20 + $0x3f0] sm:$0xff] %v845_v61  ;;  %v848_v6 = vadd.f32 %v592_v4, %v336_v3  ;;  %v594_v9 = vld [vmem:[%s1739_s29 + $0x418] sm:$0xff]  ;;  %1102 = vst [vmem:[%s1754_s20 + $0x3f8] sm:$0xff] %v846_v1  ;;  %v849_v10 = vadd.f32 %v593_v7, %v337_v5  ;;  %v339_v12 = vld [vmem:[%s1732_s19 + $0x420] sm:$0xff] }
  0xb4   : > { %1103 = vst [vmem:[%s1754_s20 + $0x400] sm:$0xff] %v847_v2  ;;  %v850_v11 = vadd.f32 %v594_v9, %v338_v8  ;;  %v595_v13 = vld [vmem:[%s1739_s29 + $0x420] sm:$0xff]  ;;  %v340_v14 = vld [vmem:[%s1732_s19 + $0x428] sm:$0xff]  ;;  %v341_v17 = vld [vmem:[%s1732_s19 + $0x430] sm:$0xff] }
  0xb5   : > { %1104 = vst [vmem:[%s1754_s20 + $0x408] sm:$0xff] %v848_v6  ;;  %v851_v15 = vadd.f32 %v595_v13, %v339_v12  ;;  %v596_v16 = vld [vmem:[%s1739_s29 + $0x428] sm:$0xff]  ;;  %v597_v18 = vld [vmem:[%s1739_s29 + $0x430] sm:$0xff]  ;;  %1105 = vst [vmem:[%s1754_s20 + $0x410] sm:$0xff] %v849_v10 }
  0xb6   : > { %1106 = vst [vmem:[%s1754_s20 + $0x418] sm:$0xff] %v850_v11  ;;  %v852_v19 = vadd.f32 %v596_v16, %v340_v14  ;;  %v853_v20 = vadd.f32 %v597_v18, %v341_v17  ;;  %v342_v21 = vld [vmem:[%s1732_s19 + $0x438] sm:$0xff]  ;;  %v343_v23 = vld [vmem:[%s1732_s19 + $0x440] sm:$0xff]  ;;  %v344_v26 = vld [vmem:[%s1732_s19 + $0x448] sm:$0xff] }
  0xb7   : > { %v598_v22 = vld [vmem:[%s1739_s29 + $0x438] sm:$0xff]  ;;  %1107 = vst [vmem:[%s1754_s20 + $0x420] sm:$0xff] %v851_v15  ;;  %v599_v25 = vld [vmem:[%s1739_s29 + $0x440] sm:$0xff]  ;;  %v600_v27 = vld [vmem:[%s1739_s29 + $0x448] sm:$0xff] }
  0xb8   : > { %v854_v24 = vadd.f32 %v598_v22, %v342_v21  ;;  %1108 = vst [vmem:[%s1754_s20 + $0x428] sm:$0xff] %v852_v19  ;;  %1109 = vst [vmem:[%s1754_s20 + $0x430] sm:$0xff] %v853_v20  ;;  %v855_v28 = vadd.f32 %v599_v25, %v343_v23  ;;  %v856_v29 = vadd.f32 %v600_v27, %v344_v26  ;;  %v345_v30 = vld [vmem:[%s1732_s19 + $0x450] sm:$0xff]  ;;  %v346_v32 = vld [vmem:[%s1732_s19 + $0x458] sm:$0xff] }
  0xb9   : > { %v601_v31 = vld [vmem:[%s1739_s29 + $0x450] sm:$0xff]  ;;  %v602_v34 = vld [vmem:[%s1739_s29 + $0x458] sm:$0xff]  ;;  %v347_v35 = vld [vmem:[%s1732_s19 + $0x460] sm:$0xff] }
  0xba   : > { %1110 = vst [vmem:[%s1754_s20 + $0x438] sm:$0xff] %v854_v24  ;;  %v857_v33 = vadd.f32 %v601_v31, %v345_v30  ;;  %v603_v36 = vld [vmem:[%s1739_s29 + $0x460] sm:$0xff]  ;;  %1111 = vst [vmem:[%s1754_s20 + $0x440] sm:$0xff] %v855_v28  ;;  %v858_v37 = vadd.f32 %v602_v34, %v346_v32  ;;  %v348_v39 = vld [vmem:[%s1732_s19 + $0x468] sm:$0xff] }
  0xbb   : > { %1112 = vst [vmem:[%s1754_s20 + $0x448] sm:$0xff] %v856_v29  ;;  %v859_v38 = vadd.f32 %v603_v36, %v347_v35  ;;  %v604_v40 = vld [vmem:[%s1739_s29 + $0x468] sm:$0xff]  ;;  %v349_v41 = vld [vmem:[%s1732_s19 + $0x470] sm:$0xff]  ;;  %v350_v44 = vld [vmem:[%s1732_s19 + $0x478] sm:$0xff] }
  0xbc   : > { %1113 = vst [vmem:[%s1754_s20 + $0x450] sm:$0xff] %v857_v33  ;;  %v860_v42 = vadd.f32 %v604_v40, %v348_v39  ;;  %v605_v43 = vld [vmem:[%s1739_s29 + $0x470] sm:$0xff]  ;;  %v606_v45 = vld [vmem:[%s1739_s29 + $0x478] sm:$0xff]  ;;  %1114 = vst [vmem:[%s1754_s20 + $0x458] sm:$0xff] %v858_v37 }
  0xbd   : > { %1115 = vst [vmem:[%s1754_s20 + $0x460] sm:$0xff] %v859_v38  ;;  %v861_v46 = vadd.f32 %v605_v43, %v349_v41  ;;  %v862_v47 = vadd.f32 %v606_v45, %v350_v44  ;;  %v351_v48 = vld [vmem:[%s1732_s19 + $0x480] sm:$0xff]  ;;  %v352_v50 = vld [vmem:[%s1732_s19 + $0x488] sm:$0xff]  ;;  %v353_v53 = vld [vmem:[%s1732_s19 + $0x490] sm:$0xff] }
  0xbe   : > { %v607_v49 = vld [vmem:[%s1739_s29 + $0x480] sm:$0xff]  ;;  %1116 = vst [vmem:[%s1754_s20 + $0x468] sm:$0xff] %v860_v42  ;;  %v608_v52 = vld [vmem:[%s1739_s29 + $0x488] sm:$0xff]  ;;  %v609_v54 = vld [vmem:[%s1739_s29 + $0x490] sm:$0xff] }
  0xbf   : > { %v863_v51 = vadd.f32 %v607_v49, %v351_v48  ;;  %1117 = vst [vmem:[%s1754_s20 + $0x470] sm:$0xff] %v861_v46  ;;  %1118 = vst [vmem:[%s1754_s20 + $0x478] sm:$0xff] %v862_v47  ;;  %v864_v55 = vadd.f32 %v608_v52, %v352_v50  ;;  %v865_v56 = vadd.f32 %v609_v54, %v353_v53  ;;  %v354_v57 = vld [vmem:[%s1732_s19 + $0x498] sm:$0xff]  ;;  %v355_v59 = vld [vmem:[%s1732_s19 + $0x4a0] sm:$0xff] }
  0xc0   : > { %v610_v58 = vld [vmem:[%s1739_s29 + $0x498] sm:$0xff]  ;;  %v611_v61 = vld [vmem:[%s1739_s29 + $0x4a0] sm:$0xff]  ;;  %v356_v62 = vld [vmem:[%s1732_s19 + $0x4a8] sm:$0xff] }
  0xc1   : > { %1119 = vst [vmem:[%s1754_s20 + $0x480] sm:$0xff] %v863_v51  ;;  %v866_v60 = vadd.f32 %v610_v58, %v354_v57  ;;  %v612_v63 = vld [vmem:[%s1739_s29 + $0x4a8] sm:$0xff]  ;;  %1120 = vst [vmem:[%s1754_s20 + $0x488] sm:$0xff] %v864_v55  ;;  %v867_v0 = vadd.f32 %v611_v61, %v355_v59  ;;  %v357_v2 = vld [vmem:[%s1732_s19 + $0x4b0] sm:$0xff] }
  0xc2   : > { %1121 = vst [vmem:[%s1754_s20 + $0x490] sm:$0xff] %v865_v56  ;;  %v868_v1 = vadd.f32 %v612_v63, %v356_v62  ;;  %v613_v3 = vld [vmem:[%s1739_s29 + $0x4b0] sm:$0xff]  ;;  %v358_v4 = vld [vmem:[%s1732_s19 + $0x4b8] sm:$0xff]  ;;  %v359_v7 = vld [vmem:[%s1732_s19 + $0x4c0] sm:$0xff] }
  0xc3   : > { %1122 = vst [vmem:[%s1754_s20 + $0x498] sm:$0xff] %v866_v60  ;;  %v869_v5 = vadd.f32 %v613_v3, %v357_v2  ;;  %v614_v6 = vld [vmem:[%s1739_s29 + $0x4b8] sm:$0xff]  ;;  %v615_v8 = vld [vmem:[%s1739_s29 + $0x4c0] sm:$0xff]  ;;  %1123 = vst [vmem:[%s1754_s20 + $0x4a0] sm:$0xff] %v867_v0 }
  0xc4   : > { %1124 = vst [vmem:[%s1754_s20 + $0x4a8] sm:$0xff] %v868_v1  ;;  %v870_v9 = vadd.f32 %v614_v6, %v358_v4  ;;  %v871_v10 = vadd.f32 %v615_v8, %v359_v7  ;;  %v360_v11 = vld [vmem:[%s1732_s19 + $0x4c8] sm:$0xff]  ;;  %v361_v13 = vld [vmem:[%s1732_s19 + $0x4d0] sm:$0xff]  ;;  %v362_v16 = vld [vmem:[%s1732_s19 + $0x4d8] sm:$0xff] }
  0xc5   : > { %v616_v12 = vld [vmem:[%s1739_s29 + $0x4c8] sm:$0xff]  ;;  %1125 = vst [vmem:[%s1754_s20 + $0x4b0] sm:$0xff] %v869_v5  ;;  %v617_v15 = vld [vmem:[%s1739_s29 + $0x4d0] sm:$0xff]  ;;  %v618_v17 = vld [vmem:[%s1739_s29 + $0x4d8] sm:$0xff] }
  0xc6   : > { %v872_v14 = vadd.f32 %v616_v12, %v360_v11  ;;  %1126 = vst [vmem:[%s1754_s20 + $0x4b8] sm:$0xff] %v870_v9  ;;  %1127 = vst [vmem:[%s1754_s20 + $0x4c0] sm:$0xff] %v871_v10  ;;  %v873_v18 = vadd.f32 %v617_v15, %v361_v13  ;;  %v874_v19 = vadd.f32 %v618_v17, %v362_v16  ;;  %v363_v20 = vld [vmem:[%s1732_s19 + $0x4e0] sm:$0xff]  ;;  %v364_v22 = vld [vmem:[%s1732_s19 + $0x4e8] sm:$0xff] }
  0xc7   : > { %v619_v21 = vld [vmem:[%s1739_s29 + $0x4e0] sm:$0xff]  ;;  %v620_v24 = vld [vmem:[%s1739_s29 + $0x4e8] sm:$0xff]  ;;  %v365_v25 = vld [vmem:[%s1732_s19 + $0x4f0] sm:$0xff] }
  0xc8   : > { %1128 = vst [vmem:[%s1754_s20 + $0x4c8] sm:$0xff] %v872_v14  ;;  %v875_v23 = vadd.f32 %v619_v21, %v363_v20  ;;  %v621_v26 = vld [vmem:[%s1739_s29 + $0x4f0] sm:$0xff]  ;;  %1129 = vst [vmem:[%s1754_s20 + $0x4d0] sm:$0xff] %v873_v18  ;;  %v876_v27 = vadd.f32 %v620_v24, %v364_v22  ;;  %v366_v29 = vld [vmem:[%s1732_s19 + $0x4f8] sm:$0xff] }
  0xc9   : > { %1130 = vst [vmem:[%s1754_s20 + $0x4d8] sm:$0xff] %v874_v19  ;;  %v877_v28 = vadd.f32 %v621_v26, %v365_v25  ;;  %v622_v30 = vld [vmem:[%s1739_s29 + $0x4f8] sm:$0xff]  ;;  %v367_v31 = vld [vmem:[%s1732_s19 + $0x500] sm:$0xff]  ;;  %v368_v34 = vld [vmem:[%s1732_s19 + $0x508] sm:$0xff] }
  0xca   : > { %1131 = vst [vmem:[%s1754_s20 + $0x4e0] sm:$0xff] %v875_v23  ;;  %v878_v32 = vadd.f32 %v622_v30, %v366_v29  ;;  %v623_v33 = vld [vmem:[%s1739_s29 + $0x500] sm:$0xff]  ;;  %v624_v35 = vld [vmem:[%s1739_s29 + $0x508] sm:$0xff]  ;;  %1132 = vst [vmem:[%s1754_s20 + $0x4e8] sm:$0xff] %v876_v27 }
  0xcb   : > { %1133 = vst [vmem:[%s1754_s20 + $0x4f0] sm:$0xff] %v877_v28  ;;  %v879_v36 = vadd.f32 %v623_v33, %v367_v31  ;;  %v880_v37 = vadd.f32 %v624_v35, %v368_v34  ;;  %v369_v38 = vld [vmem:[%s1732_s19 + $0x510] sm:$0xff]  ;;  %v370_v40 = vld [vmem:[%s1732_s19 + $0x518] sm:$0xff]  ;;  %v371_v43 = vld [vmem:[%s1732_s19 + $0x520] sm:$0xff] }
  0xcc   : > { %v625_v39 = vld [vmem:[%s1739_s29 + $0x510] sm:$0xff]  ;;  %1134 = vst [vmem:[%s1754_s20 + $0x4f8] sm:$0xff] %v878_v32  ;;  %v626_v42 = vld [vmem:[%s1739_s29 + $0x518] sm:$0xff]  ;;  %v627_v44 = vld [vmem:[%s1739_s29 + $0x520] sm:$0xff] }
  0xcd   : > { %v881_v41 = vadd.f32 %v625_v39, %v369_v38  ;;  %1135 = vst [vmem:[%s1754_s20 + $0x500] sm:$0xff] %v879_v36  ;;  %1136 = vst [vmem:[%s1754_s20 + $0x508] sm:$0xff] %v880_v37  ;;  %v882_v45 = vadd.f32 %v626_v42, %v370_v40  ;;  %v883_v46 = vadd.f32 %v627_v44, %v371_v43  ;;  %v372_v47 = vld [vmem:[%s1732_s19 + $0x528] sm:$0xff]  ;;  %v373_v49 = vld [vmem:[%s1732_s19 + $0x530] sm:$0xff] }
  0xce   : > { %v628_v48 = vld [vmem:[%s1739_s29 + $0x528] sm:$0xff]  ;;  %v629_v51 = vld [vmem:[%s1739_s29 + $0x530] sm:$0xff]  ;;  %v374_v52 = vld [vmem:[%s1732_s19 + $0x538] sm:$0xff] }
  0xcf   : > { %1137 = vst [vmem:[%s1754_s20 + $0x510] sm:$0xff] %v881_v41  ;;  %v884_v50 = vadd.f32 %v628_v48, %v372_v47  ;;  %v630_v53 = vld [vmem:[%s1739_s29 + $0x538] sm:$0xff]  ;;  %1138 = vst [vmem:[%s1754_s20 + $0x518] sm:$0xff] %v882_v45  ;;  %v885_v54 = vadd.f32 %v629_v51, %v373_v49  ;;  %v375_v56 = vld [vmem:[%s1732_s19 + $0x540] sm:$0xff] }
  0xd0   : > { %1139 = vst [vmem:[%s1754_s20 + $0x520] sm:$0xff] %v883_v46  ;;  %v886_v55 = vadd.f32 %v630_v53, %v374_v52  ;;  %v631_v57 = vld [vmem:[%s1739_s29 + $0x540] sm:$0xff]  ;;  %v376_v58 = vld [vmem:[%s1732_s19 + $0x548] sm:$0xff]  ;;  %v377_v61 = vld [vmem:[%s1732_s19 + $0x550] sm:$0xff] }
  0xd1   : > { %1140 = vst [vmem:[%s1754_s20 + $0x528] sm:$0xff] %v884_v50  ;;  %v887_v59 = vadd.f32 %v631_v57, %v375_v56  ;;  %v632_v60 = vld [vmem:[%s1739_s29 + $0x548] sm:$0xff]  ;;  %v633_v62 = vld [vmem:[%s1739_s29 + $0x550] sm:$0xff]  ;;  %1141 = vst [vmem:[%s1754_s20 + $0x530] sm:$0xff] %v885_v54 }
  0xd2   : > { %1142 = vst [vmem:[%s1754_s20 + $0x538] sm:$0xff] %v886_v55  ;;  %v888_v63 = vadd.f32 %v632_v60, %v376_v58  ;;  %v889_v0 = vadd.f32 %v633_v62, %v377_v61  ;;  %v378_v1 = vld [vmem:[%s1732_s19 + $0x558] sm:$0xff]  ;;  %v379_v3 = vld [vmem:[%s1732_s19 + $0x560] sm:$0xff]  ;;  %v380_v6 = vld [vmem:[%s1732_s19 + $0x568] sm:$0xff] }
  0xd3   : > { %v634_v2 = vld [vmem:[%s1739_s29 + $0x558] sm:$0xff]  ;;  %1143 = vst [vmem:[%s1754_s20 + $0x540] sm:$0xff] %v887_v59  ;;  %v635_v5 = vld [vmem:[%s1739_s29 + $0x560] sm:$0xff]  ;;  %v636_v7 = vld [vmem:[%s1739_s29 + $0x568] sm:$0xff] }
  0xd4   : > { %v890_v4 = vadd.f32 %v634_v2, %v378_v1  ;;  %1144 = vst [vmem:[%s1754_s20 + $0x548] sm:$0xff] %v888_v63  ;;  %1145 = vst [vmem:[%s1754_s20 + $0x550] sm:$0xff] %v889_v0  ;;  %v891_v8 = vadd.f32 %v635_v5, %v379_v3  ;;  %v892_v9 = vadd.f32 %v636_v7, %v380_v6  ;;  %v381_v10 = vld [vmem:[%s1732_s19 + $0x570] sm:$0xff]  ;;  %v382_v12 = vld [vmem:[%s1732_s19 + $0x578] sm:$0xff] }
  0xd5   : > { %v637_v11 = vld [vmem:[%s1739_s29 + $0x570] sm:$0xff]  ;;  %v638_v14 = vld [vmem:[%s1739_s29 + $0x578] sm:$0xff]  ;;  %v383_v15 = vld [vmem:[%s1732_s19 + $0x580] sm:$0xff] }
  0xd6   : > { %1146 = vst [vmem:[%s1754_s20 + $0x558] sm:$0xff] %v890_v4  ;;  %v893_v13 = vadd.f32 %v637_v11, %v381_v10  ;;  %v639_v16 = vld [vmem:[%s1739_s29 + $0x580] sm:$0xff]  ;;  %1147 = vst [vmem:[%s1754_s20 + $0x560] sm:$0xff] %v891_v8  ;;  %v894_v17 = vadd.f32 %v638_v14, %v382_v12  ;;  %v384_v19 = vld [vmem:[%s1732_s19 + $0x588] sm:$0xff] }
  0xd7   : > { %1148 = vst [vmem:[%s1754_s20 + $0x568] sm:$0xff] %v892_v9  ;;  %v895_v18 = vadd.f32 %v639_v16, %v383_v15  ;;  %v640_v20 = vld [vmem:[%s1739_s29 + $0x588] sm:$0xff]  ;;  %v385_v21 = vld [vmem:[%s1732_s19 + $0x590] sm:$0xff]  ;;  %v386_v24 = vld [vmem:[%s1732_s19 + $0x598] sm:$0xff] }
  0xd8   : > { %1149 = vst [vmem:[%s1754_s20 + $0x570] sm:$0xff] %v893_v13  ;;  %v896_v22 = vadd.f32 %v640_v20, %v384_v19  ;;  %v641_v23 = vld [vmem:[%s1739_s29 + $0x590] sm:$0xff]  ;;  %v642_v25 = vld [vmem:[%s1739_s29 + $0x598] sm:$0xff]  ;;  %1150 = vst [vmem:[%s1754_s20 + $0x578] sm:$0xff] %v894_v17 }
  0xd9   : > { %1151 = vst [vmem:[%s1754_s20 + $0x580] sm:$0xff] %v895_v18  ;;  %v897_v26 = vadd.f32 %v641_v23, %v385_v21  ;;  %v898_v27 = vadd.f32 %v642_v25, %v386_v24  ;;  %v387_v28 = vld [vmem:[%s1732_s19 + $0x5a0] sm:$0xff]  ;;  %v388_v30 = vld [vmem:[%s1732_s19 + $0x5a8] sm:$0xff]  ;;  %v389_v33 = vld [vmem:[%s1732_s19 + $0x5b0] sm:$0xff] }
  0xda   : > { %v643_v29 = vld [vmem:[%s1739_s29 + $0x5a0] sm:$0xff]  ;;  %1152 = vst [vmem:[%s1754_s20 + $0x588] sm:$0xff] %v896_v22  ;;  %v644_v32 = vld [vmem:[%s1739_s29 + $0x5a8] sm:$0xff]  ;;  %v645_v34 = vld [vmem:[%s1739_s29 + $0x5b0] sm:$0xff] }
  0xdb   : > { %v899_v31 = vadd.f32 %v643_v29, %v387_v28  ;;  %1153 = vst [vmem:[%s1754_s20 + $0x590] sm:$0xff] %v897_v26  ;;  %1154 = vst [vmem:[%s1754_s20 + $0x598] sm:$0xff] %v898_v27  ;;  %v900_v35 = vadd.f32 %v644_v32, %v388_v30  ;;  %v901_v36 = vadd.f32 %v645_v34, %v389_v33  ;;  %v390_v37 = vld [vmem:[%s1732_s19 + $0x5b8] sm:$0xff]  ;;  %v391_v39 = vld [vmem:[%s1732_s19 + $0x5c0] sm:$0xff] }
  0xdc   : > { %v646_v38 = vld [vmem:[%s1739_s29 + $0x5b8] sm:$0xff]  ;;  %v647_v41 = vld [vmem:[%s1739_s29 + $0x5c0] sm:$0xff]  ;;  %v392_v42 = vld [vmem:[%s1732_s19 + $0x5c8] sm:$0xff] }
  0xdd   : > { %1155 = vst [vmem:[%s1754_s20 + $0x5a0] sm:$0xff] %v899_v31  ;;  %v902_v40 = vadd.f32 %v646_v38, %v390_v37  ;;  %v648_v43 = vld [vmem:[%s1739_s29 + $0x5c8] sm:$0xff]  ;;  %1156 = vst [vmem:[%s1754_s20 + $0x5a8] sm:$0xff] %v900_v35  ;;  %v903_v44 = vadd.f32 %v647_v41, %v391_v39  ;;  %v393_v46 = vld [vmem:[%s1732_s19 + $0x5d0] sm:$0xff] }
  0xde   : > { %1157 = vst [vmem:[%s1754_s20 + $0x5b0] sm:$0xff] %v901_v36  ;;  %v904_v45 = vadd.f32 %v648_v43, %v392_v42  ;;  %v649_v47 = vld [vmem:[%s1739_s29 + $0x5d0] sm:$0xff]  ;;  %v394_v48 = vld [vmem:[%s1732_s19 + $0x5d8] sm:$0xff]  ;;  %v395_v51 = vld [vmem:[%s1732_s19 + $0x5e0] sm:$0xff] }
  0xdf   : > { %1158 = vst [vmem:[%s1754_s20 + $0x5b8] sm:$0xff] %v902_v40  ;;  %v905_v49 = vadd.f32 %v649_v47, %v393_v46  ;;  %v650_v50 = vld [vmem:[%s1739_s29 + $0x5d8] sm:$0xff]  ;;  %v651_v52 = vld [vmem:[%s1739_s29 + $0x5e0] sm:$0xff]  ;;  %1159 = vst [vmem:[%s1754_s20 + $0x5c0] sm:$0xff] %v903_v44 }
  0xe0   : > { %1160 = vst [vmem:[%s1754_s20 + $0x5c8] sm:$0xff] %v904_v45  ;;  %v906_v53 = vadd.f32 %v650_v50, %v394_v48  ;;  %v907_v54 = vadd.f32 %v651_v52, %v395_v51  ;;  %v396_v55 = vld [vmem:[%s1732_s19 + $0x5e8] sm:$0xff]  ;;  %v397_v57 = vld [vmem:[%s1732_s19 + $0x5f0] sm:$0xff]  ;;  %v398_v60 = vld [vmem:[%s1732_s19 + $0x5f8] sm:$0xff] }
  0xe1   : > { %v652_v56 = vld [vmem:[%s1739_s29 + $0x5e8] sm:$0xff]  ;;  %1161 = vst [vmem:[%s1754_s20 + $0x5d0] sm:$0xff] %v905_v49  ;;  %v653_v59 = vld [vmem:[%s1739_s29 + $0x5f0] sm:$0xff]  ;;  %v654_v61 = vld [vmem:[%s1739_s29 + $0x5f8] sm:$0xff] }
  0xe2   : > { %v908_v58 = vadd.f32 %v652_v56, %v396_v55  ;;  %1162 = vst [vmem:[%s1754_s20 + $0x5d8] sm:$0xff] %v906_v53  ;;  %1163 = vst [vmem:[%s1754_s20 + $0x5e0] sm:$0xff] %v907_v54  ;;  %v909_v62 = vadd.f32 %v653_v59, %v397_v57  ;;  %v910_v63 = vadd.f32 %v654_v61, %v398_v60  ;;  %v399_v0 = vld [vmem:[%s1732_s19 + $0x600] sm:$0xff]  ;;  %v400_v2 = vld [vmem:[%s1732_s19 + $0x608] sm:$0xff] }
  0xe3   : > { %v655_v1 = vld [vmem:[%s1739_s29 + $0x600] sm:$0xff]  ;;  %v656_v4 = vld [vmem:[%s1739_s29 + $0x608] sm:$0xff]  ;;  %v401_v5 = vld [vmem:[%s1732_s19 + $0x610] sm:$0xff] }
  0xe4   : > { %1164 = vst [vmem:[%s1754_s20 + $0x5e8] sm:$0xff] %v908_v58  ;;  %v911_v3 = vadd.f32 %v655_v1, %v399_v0  ;;  %v657_v6 = vld [vmem:[%s1739_s29 + $0x610] sm:$0xff]  ;;  %1165 = vst [vmem:[%s1754_s20 + $0x5f0] sm:$0xff] %v909_v62  ;;  %v912_v7 = vadd.f32 %v656_v4, %v400_v2  ;;  %v402_v9 = vld [vmem:[%s1732_s19 + $0x618] sm:$0xff] }
  0xe5   : > { %1166 = vst [vmem:[%s1754_s20 + $0x5f8] sm:$0xff] %v910_v63  ;;  %v913_v8 = vadd.f32 %v657_v6, %v401_v5  ;;  %v658_v10 = vld [vmem:[%s1739_s29 + $0x618] sm:$0xff]  ;;  %v403_v11 = vld [vmem:[%s1732_s19 + $0x620] sm:$0xff]  ;;  %v404_v14 = vld [vmem:[%s1732_s19 + $0x628] sm:$0xff] }
  0xe6   : > { %1167 = vst [vmem:[%s1754_s20 + $0x600] sm:$0xff] %v911_v3  ;;  %v914_v12 = vadd.f32 %v658_v10, %v402_v9  ;;  %v659_v13 = vld [vmem:[%s1739_s29 + $0x620] sm:$0xff]  ;;  %v660_v15 = vld [vmem:[%s1739_s29 + $0x628] sm:$0xff]  ;;  %1168 = vst [vmem:[%s1754_s20 + $0x608] sm:$0xff] %v912_v7 }
  0xe7   : > { %1169 = vst [vmem:[%s1754_s20 + $0x610] sm:$0xff] %v913_v8  ;;  %v915_v16 = vadd.f32 %v659_v13, %v403_v11  ;;  %v916_v17 = vadd.f32 %v660_v15, %v404_v14  ;;  %v405_v18 = vld [vmem:[%s1732_s19 + $0x630] sm:$0xff]  ;;  %v406_v20 = vld [vmem:[%s1732_s19 + $0x638] sm:$0xff]  ;;  %v407_v23 = vld [vmem:[%s1732_s19 + $0x640] sm:$0xff] }
  0xe8   : > { %v661_v19 = vld [vmem:[%s1739_s29 + $0x630] sm:$0xff]  ;;  %1170 = vst [vmem:[%s1754_s20 + $0x618] sm:$0xff] %v914_v12  ;;  %v662_v22 = vld [vmem:[%s1739_s29 + $0x638] sm:$0xff]  ;;  %v663_v24 = vld [vmem:[%s1739_s29 + $0x640] sm:$0xff] }
  0xe9   : > { %v917_v21 = vadd.f32 %v661_v19, %v405_v18  ;;  %1171 = vst [vmem:[%s1754_s20 + $0x620] sm:$0xff] %v915_v16  ;;  %1172 = vst [vmem:[%s1754_s20 + $0x628] sm:$0xff] %v916_v17  ;;  %v918_v25 = vadd.f32 %v662_v22, %v406_v20  ;;  %v919_v26 = vadd.f32 %v663_v24, %v407_v23  ;;  %v408_v27 = vld [vmem:[%s1732_s19 + $0x648] sm:$0xff]  ;;  %v409_v29 = vld [vmem:[%s1732_s19 + $0x650] sm:$0xff] }
  0xea   : > { %v664_v28 = vld [vmem:[%s1739_s29 + $0x648] sm:$0xff]  ;;  %v665_v31 = vld [vmem:[%s1739_s29 + $0x650] sm:$0xff]  ;;  %v410_v32 = vld [vmem:[%s1732_s19 + $0x658] sm:$0xff] }
  0xeb   : > { %1173 = vst [vmem:[%s1754_s20 + $0x630] sm:$0xff] %v917_v21  ;;  %v920_v30 = vadd.f32 %v664_v28, %v408_v27  ;;  %v666_v33 = vld [vmem:[%s1739_s29 + $0x658] sm:$0xff]  ;;  %1174 = vst [vmem:[%s1754_s20 + $0x638] sm:$0xff] %v918_v25  ;;  %v921_v34 = vadd.f32 %v665_v31, %v409_v29  ;;  %v411_v36 = vld [vmem:[%s1732_s19 + $0x660] sm:$0xff] }
  0xec   : > { %1175 = vst [vmem:[%s1754_s20 + $0x640] sm:$0xff] %v919_v26  ;;  %v922_v35 = vadd.f32 %v666_v33, %v410_v32  ;;  %v667_v37 = vld [vmem:[%s1739_s29 + $0x660] sm:$0xff]  ;;  %v412_v38 = vld [vmem:[%s1732_s19 + $0x668] sm:$0xff]  ;;  %v413_v41 = vld [vmem:[%s1732_s19 + $0x670] sm:$0xff] }
  0xed   : > { %1176 = vst [vmem:[%s1754_s20 + $0x648] sm:$0xff] %v920_v30  ;;  %v923_v39 = vadd.f32 %v667_v37, %v411_v36  ;;  %v668_v40 = vld [vmem:[%s1739_s29 + $0x668] sm:$0xff]  ;;  %v669_v42 = vld [vmem:[%s1739_s29 + $0x670] sm:$0xff]  ;;  %1177 = vst [vmem:[%s1754_s20 + $0x650] sm:$0xff] %v921_v34 }
  0xee   : > { %1178 = vst [vmem:[%s1754_s20 + $0x658] sm:$0xff] %v922_v35  ;;  %v924_v43 = vadd.f32 %v668_v40, %v412_v38  ;;  %v925_v44 = vadd.f32 %v669_v42, %v413_v41  ;;  %v414_v45 = vld [vmem:[%s1732_s19 + $0x678] sm:$0xff]  ;;  %v415_v47 = vld [vmem:[%s1732_s19 + $0x680] sm:$0xff]  ;;  %v416_v50 = vld [vmem:[%s1732_s19 + $0x688] sm:$0xff] }
  0xef   : > { %v670_v46 = vld [vmem:[%s1739_s29 + $0x678] sm:$0xff]  ;;  %1179 = vst [vmem:[%s1754_s20 + $0x660] sm:$0xff] %v923_v39  ;;  %v671_v49 = vld [vmem:[%s1739_s29 + $0x680] sm:$0xff]  ;;  %v672_v51 = vld [vmem:[%s1739_s29 + $0x688] sm:$0xff] }
  0xf0   : > { %v926_v48 = vadd.f32 %v670_v46, %v414_v45  ;;  %1180 = vst [vmem:[%s1754_s20 + $0x668] sm:$0xff] %v924_v43  ;;  %1181 = vst [vmem:[%s1754_s20 + $0x670] sm:$0xff] %v925_v44  ;;  %v927_v52 = vadd.f32 %v671_v49, %v415_v47  ;;  %v928_v53 = vadd.f32 %v672_v51, %v416_v50  ;;  %v417_v54 = vld [vmem:[%s1732_s19 + $0x690] sm:$0xff]  ;;  %v418_v56 = vld [vmem:[%s1732_s19 + $0x698] sm:$0xff] }
  0xf1   : > { %v673_v55 = vld [vmem:[%s1739_s29 + $0x690] sm:$0xff]  ;;  %v674_v58 = vld [vmem:[%s1739_s29 + $0x698] sm:$0xff]  ;;  %v419_v59 = vld [vmem:[%s1732_s19 + $0x6a0] sm:$0xff] }
  0xf2   : > { %1182 = vst [vmem:[%s1754_s20 + $0x678] sm:$0xff] %v926_v48  ;;  %v929_v57 = vadd.f32 %v673_v55, %v417_v54  ;;  %v675_v60 = vld [vmem:[%s1739_s29 + $0x6a0] sm:$0xff]  ;;  %1183 = vst [vmem:[%s1754_s20 + $0x680] sm:$0xff] %v927_v52  ;;  %v930_v61 = vadd.f32 %v674_v58, %v418_v56  ;;  %v420_v63 = vld [vmem:[%s1732_s19 + $0x6a8] sm:$0xff] }
  0xf3   : > { %1184 = vst [vmem:[%s1754_s20 + $0x688] sm:$0xff] %v928_v53  ;;  %v931_v62 = vadd.f32 %v675_v60, %v419_v59  ;;  %v676_v0 = vld [vmem:[%s1739_s29 + $0x6a8] sm:$0xff]  ;;  %v421_v1 = vld [vmem:[%s1732_s19 + $0x6b0] sm:$0xff]  ;;  %v422_v4 = vld [vmem:[%s1732_s19 + $0x6b8] sm:$0xff] }
  0xf4   : > { %1185 = vst [vmem:[%s1754_s20 + $0x690] sm:$0xff] %v929_v57  ;;  %v932_v2 = vadd.f32 %v676_v0, %v420_v63  ;;  %v677_v3 = vld [vmem:[%s1739_s29 + $0x6b0] sm:$0xff]  ;;  %v678_v5 = vld [vmem:[%s1739_s29 + $0x6b8] sm:$0xff]  ;;  %1186 = vst [vmem:[%s1754_s20 + $0x698] sm:$0xff] %v930_v61 }
  0xf5   : > { %1187 = vst [vmem:[%s1754_s20 + $0x6a0] sm:$0xff] %v931_v62  ;;  %v933_v6 = vadd.f32 %v677_v3, %v421_v1  ;;  %v934_v7 = vadd.f32 %v678_v5, %v422_v4  ;;  %v423_v8 = vld [vmem:[%s1732_s19 + $0x6c0] sm:$0xff]  ;;  %v424_v10 = vld [vmem:[%s1732_s19 + $0x6c8] sm:$0xff]  ;;  %v425_v13 = vld [vmem:[%s1732_s19 + $0x6d0] sm:$0xff] }
  0xf6   : > { %v679_v9 = vld [vmem:[%s1739_s29 + $0x6c0] sm:$0xff]  ;;  %1188 = vst [vmem:[%s1754_s20 + $0x6a8] sm:$0xff] %v932_v2  ;;  %v680_v12 = vld [vmem:[%s1739_s29 + $0x6c8] sm:$0xff]  ;;  %v681_v14 = vld [vmem:[%s1739_s29 + $0x6d0] sm:$0xff] }
  0xf7   : > { %v935_v11 = vadd.f32 %v679_v9, %v423_v8  ;;  %1189 = vst [vmem:[%s1754_s20 + $0x6b0] sm:$0xff] %v933_v6  ;;  %1190 = vst [vmem:[%s1754_s20 + $0x6b8] sm:$0xff] %v934_v7  ;;  %v936_v15 = vadd.f32 %v680_v12, %v424_v10  ;;  %v937_v16 = vadd.f32 %v681_v14, %v425_v13  ;;  %v426_v17 = vld [vmem:[%s1732_s19 + $0x6d8] sm:$0xff]  ;;  %v427_v19 = vld [vmem:[%s1732_s19 + $0x6e0] sm:$0xff] }
  0xf8   : > { %v682_v18 = vld [vmem:[%s1739_s29 + $0x6d8] sm:$0xff]  ;;  %v683_v21 = vld [vmem:[%s1739_s29 + $0x6e0] sm:$0xff]  ;;  %v428_v22 = vld [vmem:[%s1732_s19 + $0x6e8] sm:$0xff] }
  0xf9   : > { %1191 = vst [vmem:[%s1754_s20 + $0x6c0] sm:$0xff] %v935_v11  ;;  %v938_v20 = vadd.f32 %v682_v18, %v426_v17  ;;  %v684_v23 = vld [vmem:[%s1739_s29 + $0x6e8] sm:$0xff]  ;;  %1192 = vst [vmem:[%s1754_s20 + $0x6c8] sm:$0xff] %v936_v15  ;;  %v939_v24 = vadd.f32 %v683_v21, %v427_v19  ;;  %v429_v26 = vld [vmem:[%s1732_s19 + $0x6f0] sm:$0xff] }
  0xfa   : > { %1193 = vst [vmem:[%s1754_s20 + $0x6d0] sm:$0xff] %v937_v16  ;;  %v940_v25 = vadd.f32 %v684_v23, %v428_v22  ;;  %v685_v27 = vld [vmem:[%s1739_s29 + $0x6f0] sm:$0xff]  ;;  %v430_v28 = vld [vmem:[%s1732_s19 + $0x6f8] sm:$0xff]  ;;  %v431_v31 = vld [vmem:[%s1732_s19 + $0x700] sm:$0xff] }
  0xfb   : > { %1194 = vst [vmem:[%s1754_s20 + $0x6d8] sm:$0xff] %v938_v20  ;;  %v941_v29 = vadd.f32 %v685_v27, %v429_v26  ;;  %v686_v30 = vld [vmem:[%s1739_s29 + $0x6f8] sm:$0xff]  ;;  %v687_v32 = vld [vmem:[%s1739_s29 + $0x700] sm:$0xff]  ;;  %1195 = vst [vmem:[%s1754_s20 + $0x6e0] sm:$0xff] %v939_v24 }
  0xfc   : > { %1196 = vst [vmem:[%s1754_s20 + $0x6e8] sm:$0xff] %v940_v25  ;;  %v942_v33 = vadd.f32 %v686_v30, %v430_v28  ;;  %v943_v34 = vadd.f32 %v687_v32, %v431_v31  ;;  %v432_v35 = vld [vmem:[%s1732_s19 + $0x708] sm:$0xff]  ;;  %v433_v37 = vld [vmem:[%s1732_s19 + $0x710] sm:$0xff]  ;;  %v434_v40 = vld [vmem:[%s1732_s19 + $0x718] sm:$0xff] }
  0xfd   : > { %v688_v36 = vld [vmem:[%s1739_s29 + $0x708] sm:$0xff]  ;;  %1197 = vst [vmem:[%s1754_s20 + $0x6f0] sm:$0xff] %v941_v29  ;;  %v689_v39 = vld [vmem:[%s1739_s29 + $0x710] sm:$0xff]  ;;  %v690_v41 = vld [vmem:[%s1739_s29 + $0x718] sm:$0xff] }
  0xfe   : > { %v944_v38 = vadd.f32 %v688_v36, %v432_v35  ;;  %1198 = vst [vmem:[%s1754_s20 + $0x6f8] sm:$0xff] %v942_v33  ;;  %1199 = vst [vmem:[%s1754_s20 + $0x700] sm:$0xff] %v943_v34  ;;  %v945_v42 = vadd.f32 %v689_v39, %v433_v37  ;;  %v946_v43 = vadd.f32 %v690_v41, %v434_v40  ;;  %v435_v44 = vld [vmem:[%s1732_s19 + $0x720] sm:$0xff]  ;;  %v436_v46 = vld [vmem:[%s1732_s19 + $0x728] sm:$0xff] }
  0xff   : > { %v691_v45 = vld [vmem:[%s1739_s29 + $0x720] sm:$0xff]  ;;  %v692_v48 = vld [vmem:[%s1739_s29 + $0x728] sm:$0xff]  ;;  %v437_v49 = vld [vmem:[%s1732_s19 + $0x730] sm:$0xff] }
 0x100   : > { %1200 = vst [vmem:[%s1754_s20 + $0x708] sm:$0xff] %v944_v38  ;;  %v947_v47 = vadd.f32 %v691_v45, %v435_v44  ;;  %v693_v50 = vld [vmem:[%s1739_s29 + $0x730] sm:$0xff]  ;;  %1201 = vst [vmem:[%s1754_s20 + $0x710] sm:$0xff] %v945_v42  ;;  %v948_v51 = vadd.f32 %v692_v48, %v436_v46  ;;  %v438_v53 = vld [vmem:[%s1732_s19 + $0x738] sm:$0xff] }
 0x101   : > { %1202 = vst [vmem:[%s1754_s20 + $0x718] sm:$0xff] %v946_v43  ;;  %v949_v52 = vadd.f32 %v693_v50, %v437_v49  ;;  %v694_v54 = vld [vmem:[%s1739_s29 + $0x738] sm:$0xff]  ;;  %v439_v55 = vld [vmem:[%s1732_s19 + $0x740] sm:$0xff]  ;;  %v440_v58 = vld [vmem:[%s1732_s19 + $0x748] sm:$0xff] }
 0x102   : > { %1203 = vst [vmem:[%s1754_s20 + $0x720] sm:$0xff] %v947_v47  ;;  %v950_v56 = vadd.f32 %v694_v54, %v438_v53  ;;  %v695_v57 = vld [vmem:[%s1739_s29 + $0x740] sm:$0xff]  ;;  %v696_v59 = vld [vmem:[%s1739_s29 + $0x748] sm:$0xff]  ;;  %1204 = vst [vmem:[%s1754_s20 + $0x728] sm:$0xff] %v948_v51 }
 0x103   : > { %1205 = vst [vmem:[%s1754_s20 + $0x730] sm:$0xff] %v949_v52  ;;  %v951_v60 = vadd.f32 %v695_v57, %v439_v55  ;;  %v952_v61 = vadd.f32 %v696_v59, %v440_v58  ;;  %v441_v62 = vld [vmem:[%s1732_s19 + $0x750] sm:$0xff]  ;;  %v442_v0 = vld [vmem:[%s1732_s19 + $0x758] sm:$0xff]  ;;  %v443_v3 = vld [vmem:[%s1732_s19 + $0x760] sm:$0xff] }
 0x104   : > { %v697_v63 = vld [vmem:[%s1739_s29 + $0x750] sm:$0xff]  ;;  %1206 = vst [vmem:[%s1754_s20 + $0x738] sm:$0xff] %v950_v56  ;;  %v698_v2 = vld [vmem:[%s1739_s29 + $0x758] sm:$0xff]  ;;  %v699_v4 = vld [vmem:[%s1739_s29 + $0x760] sm:$0xff] }
 0x105   : > { %v953_v1 = vadd.f32 %v697_v63, %v441_v62  ;;  %1207 = vst [vmem:[%s1754_s20 + $0x740] sm:$0xff] %v951_v60  ;;  %1208 = vst [vmem:[%s1754_s20 + $0x748] sm:$0xff] %v952_v61  ;;  %v954_v5 = vadd.f32 %v698_v2, %v442_v0  ;;  %v955_v6 = vadd.f32 %v699_v4, %v443_v3  ;;  %v444_v7 = vld [vmem:[%s1732_s19 + $0x768] sm:$0xff]  ;;  %v445_v9 = vld [vmem:[%s1732_s19 + $0x770] sm:$0xff] }
 0x106   : > { %v700_v8 = vld [vmem:[%s1739_s29 + $0x768] sm:$0xff]  ;;  %v701_v11 = vld [vmem:[%s1739_s29 + $0x770] sm:$0xff]  ;;  %v446_v12 = vld [vmem:[%s1732_s19 + $0x778] sm:$0xff] }
 0x107   : > { %1209 = vst [vmem:[%s1754_s20 + $0x750] sm:$0xff] %v953_v1  ;;  %v956_v10 = vadd.f32 %v700_v8, %v444_v7  ;;  %v702_v13 = vld [vmem:[%s1739_s29 + $0x778] sm:$0xff]  ;;  %1210 = vst [vmem:[%s1754_s20 + $0x758] sm:$0xff] %v954_v5  ;;  %v957_v14 = vadd.f32 %v701_v11, %v445_v9  ;;  %v447_v16 = vld [vmem:[%s1732_s19 + $0x780] sm:$0xff] }
 0x108   : > { %1211 = vst [vmem:[%s1754_s20 + $0x760] sm:$0xff] %v955_v6  ;;  %v958_v15 = vadd.f32 %v702_v13, %v446_v12  ;;  %v703_v17 = vld [vmem:[%s1739_s29 + $0x780] sm:$0xff]  ;;  %v448_v18 = vld [vmem:[%s1732_s19 + $0x788] sm:$0xff]  ;;  %v449_v21 = vld [vmem:[%s1732_s19 + $0x790] sm:$0xff] }
 0x109   : > { %1212 = vst [vmem:[%s1754_s20 + $0x768] sm:$0xff] %v956_v10  ;;  %v959_v19 = vadd.f32 %v703_v17, %v447_v16  ;;  %v704_v20 = vld [vmem:[%s1739_s29 + $0x788] sm:$0xff]  ;;  %v705_v22 = vld [vmem:[%s1739_s29 + $0x790] sm:$0xff]  ;;  %1213 = vst [vmem:[%s1754_s20 + $0x770] sm:$0xff] %v957_v14 }
 0x10a   : > { %1214 = vst [vmem:[%s1754_s20 + $0x778] sm:$0xff] %v958_v15  ;;  %v960_v23 = vadd.f32 %v704_v20, %v448_v18  ;;  %v961_v24 = vadd.f32 %v705_v22, %v449_v21  ;;  %v450_v25 = vld [vmem:[%s1732_s19 + $0x798] sm:$0xff]  ;;  %v451_v27 = vld [vmem:[%s1732_s19 + $0x7a0] sm:$0xff]  ;;  %v452_v30 = vld [vmem:[%s1732_s19 + $0x7a8] sm:$0xff] }
 0x10b   : > { %v706_v26 = vld [vmem:[%s1739_s29 + $0x798] sm:$0xff]  ;;  %1215 = vst [vmem:[%s1754_s20 + $0x780] sm:$0xff] %v959_v19  ;;  %v707_v29 = vld [vmem:[%s1739_s29 + $0x7a0] sm:$0xff]  ;;  %v708_v31 = vld [vmem:[%s1739_s29 + $0x7a8] sm:$0xff] }
 0x10c   : > { %v962_v28 = vadd.f32 %v706_v26, %v450_v25  ;;  %1216 = vst [vmem:[%s1754_s20 + $0x788] sm:$0xff] %v960_v23  ;;  %1217 = vst [vmem:[%s1754_s20 + $0x790] sm:$0xff] %v961_v24  ;;  %v963_v32 = vadd.f32 %v707_v29, %v451_v27  ;;  %v964_v33 = vadd.f32 %v708_v31, %v452_v30  ;;  %v453_v34 = vld [vmem:[%s1732_s19 + $0x7b0] sm:$0xff]  ;;  %v454_v36 = vld [vmem:[%s1732_s19 + $0x7b8] sm:$0xff] }
 0x10d   : > { %v709_v35 = vld [vmem:[%s1739_s29 + $0x7b0] sm:$0xff]  ;;  %v710_v38 = vld [vmem:[%s1739_s29 + $0x7b8] sm:$0xff]  ;;  %v455_v39 = vld [vmem:[%s1732_s19 + $0x7c0] sm:$0xff] }
 0x10e   : > { %1218 = vst [vmem:[%s1754_s20 + $0x798] sm:$0xff] %v962_v28  ;;  %v965_v37 = vadd.f32 %v709_v35, %v453_v34  ;;  %v711_v40 = vld [vmem:[%s1739_s29 + $0x7c0] sm:$0xff]  ;;  %1219 = vst [vmem:[%s1754_s20 + $0x7a0] sm:$0xff] %v963_v32  ;;  %v966_v41 = vadd.f32 %v710_v38, %v454_v36  ;;  %v456_v43 = vld [vmem:[%s1732_s19 + $0x7c8] sm:$0xff] }
 0x10f   : > { %1220 = vst [vmem:[%s1754_s20 + $0x7a8] sm:$0xff] %v964_v33  ;;  %v967_v42 = vadd.f32 %v711_v40, %v455_v39  ;;  %v712_v44 = vld [vmem:[%s1739_s29 + $0x7c8] sm:$0xff]  ;;  %v457_v45 = vld [vmem:[%s1732_s19 + $0x7d0] sm:$0xff]  ;;  %v458_v48 = vld [vmem:[%s1732_s19 + $0x7d8] sm:$0xff] }
 0x110   : > { %1221 = vst [vmem:[%s1754_s20 + $0x7b0] sm:$0xff] %v965_v37  ;;  %v968_v46 = vadd.f32 %v712_v44, %v456_v43  ;;  %v713_v47 = vld [vmem:[%s1739_s29 + $0x7d0] sm:$0xff]  ;;  %v714_v49 = vld [vmem:[%s1739_s29 + $0x7d8] sm:$0xff]  ;;  %1222 = vst [vmem:[%s1754_s20 + $0x7b8] sm:$0xff] %v966_v41 }
 0x111   : > { %1223 = vst [vmem:[%s1754_s20 + $0x7c0] sm:$0xff] %v967_v42  ;;  %v969_v50 = vadd.f32 %v713_v47, %v457_v45  ;;  %v970_v51 = vadd.f32 %v714_v49, %v458_v48  ;;  %v459_v52 = vld [vmem:[%s1732_s19 + $0x7e0] sm:$0xff]  ;;  %v460_v54 = vld [vmem:[%s1732_s19 + $0x7e8] sm:$0xff]  ;;  %v461_v57 = vld [vmem:[%s1732_s19 + $0x7f0] sm:$0xff] }
 0x112   : > { %v715_v53 = vld [vmem:[%s1739_s29 + $0x7e0] sm:$0xff]  ;;  %1224 = vst [vmem:[%s1754_s20 + $0x7c8] sm:$0xff] %v968_v46  ;;  %v716_v56 = vld [vmem:[%s1739_s29 + $0x7e8] sm:$0xff]  ;;  %v717_v58 = vld [vmem:[%s1739_s29 + $0x7f0] sm:$0xff] }
 0x113   : > { %v971_v55 = vadd.f32 %v715_v53, %v459_v52  ;;  %1225 = vst [vmem:[%s1754_s20 + $0x7d0] sm:$0xff] %v969_v50  ;;  %1226 = vst [vmem:[%s1754_s20 + $0x7d8] sm:$0xff] %v970_v51  ;;  %v972_v59 = vadd.f32 %v716_v56, %v460_v54  ;;  %v973_v60 = vadd.f32 %v717_v58, %v461_v57  ;;  %v462_v61 = vld [vmem:[%s1732_s19 + $0x7f8] sm:$0xff] }
 0x114   : > { %v718_v62 = vld [vmem:[%s1739_s29 + $0x7f8] sm:$0xff] }
 0x115   : > { %1227 = vst [vmem:[%s1754_s20 + $0x7e0] sm:$0xff] %v971_v55  ;;  %v974_v63 = vadd.f32 %v718_v62, %v462_v61  ;;  %1228 = vst [vmem:[%s1754_s20 + $0x7e8] sm:$0xff] %v972_v59 }
 0x116   : > { %1229 = vst [vmem:[%s1754_s20 + $0x7f0] sm:$0xff] %v973_v60 }
 0x117   : > { %1230 = vst [vmem:[%s1754_s20 + $0x7f8] sm:$0xff] %v974_v63 }
 0x118   : > { %1493 = shalt.err (!%p1490_p4)
}
 0x119   : > { %s1494_s25 = scalar_lea.hbm %s2516_s17, 32768  ;;  %s1498_s30 = scalar_lea.hbm %s2567_s2, 65536 }
 0x11a   : > { %p1495_p9 = scmp.ne.s32.totalorder %s2516_s17, %s1494_s25  ;;  %p1499_p5 = scmp.lt.s32.totalorder %s2516_s17, %s2567_s2 }
 0x11b   : > { %p1500_p8 = scmp.lt.s32.totalorder %s1498_s30, %s1494_s25 }
 0x11c   : > { %p1496_p11 = pnand %p1495_p9, %p2577_p1 }
 0x11d   : > { %p1501_p6 = por %p1500_p8, %p1499_p5 }
 0x11e   : > { %p1497_p3 = pneg %p1496_p11 }
 0x120   : > { %p1502_p13 = pnand %p1501_p6, %p1497_p3 }
 0x122   : > { %1505 = shalt.err (!%p1502_p13)
}
 0x123   : > { %s1555_s3 = smov 1024   ;;  %s1556_s29 = smov 64  }
 0x124   : > { %1373 = dma.vmem_to_hbm [thread:$0]  (%p2577_p1), %s2518_s6, 32768, %s2516_s17, %s1232_s28, %s1555_s3, %s1555_s3, %s1556_s29  }
 0x125 PF: > { %s1261_s20 = sand.u32 1, %s1536_s9   ;;  %p2578_p12 = scmp.ne.s32.totalorder %s2573_s22, 0 }
 0x126   : > { %p2579_p7 = scmp.ge.s32.totalorder %s1548_s12, 2  ;;  %s1262_s5 = scalar_lea.sflag [#allocation4], %s1261_s20 }
 0x128   : > { %p1383_p10 = pnand %p2579_p7, %p2578_p12 }
 0x12a   : > { %p1384_p0 = pneg %p1383_p10 }
 0x12c   : > { %1531 = dma.done.wait (%p1384_p0), %s1262_s5, 32768  }
 0x12d   : > { %1533 = vsyncadd (%p1384_p0), %s1262_s5, 4294934528  ;;  %p18_p2 = scmp.ge.s32.totalorder %s1597_s15, 4   ;;  %s2580_s9 = smov %s1540_s10 }
 0x12e   : > { %s2581_s10 = smov %s1544_s11  ;;  %s2582_s11 = smov %s1609_s18 }
 0x12f   : > { %s2583_s12 = smov %s1597_s15  ;;  %20 = sbr.rel (!%p18_p2) target bundleno = 7 (0x7), region = 86 }
 0x134   :  { %1267 = vsyncpa [#allocation3], 1 }
 0x135   :  { %1269 = vsyncpa [#allocation3 + $0x1], 1 }
 0x136   :  { %1270 = vsyncpa [#allocation6], 1 }
 0x137   :  { %1272 = vsyncpa [#allocation6 + $0x1], 1 }
 0x138   :  { %1273 = vsyncpa [#allocation4], 1 }
 0x139   :  { %1275 = vsyncpa [#allocation4 + $0x1], 1 }

</bundles_post_ra>
